<compile_context>
chip_gen: v5e
topology: v5e:2x2
jax: 0.10.0
libtpu: 0.0.40
codegen_flags: <defaults>
</compile_context>

<pallas_src>
import functools

import jax
import jax.numpy as jnp
from jax import lax
from jax.experimental import pallas as pl
from jax.experimental.pallas import tpu as pltpu


# ------------------------------ fused kernel ----------------------------------

def _lrp_decoder_kernel(cls_ref,                         # SMEM scalar prefetch: (B,) int32
                        x_ref,                           # (H, W*Cin)   one batch element
                        n1_ref, b1_ref,                  # fwd conv1 banded taps / bias row
                        n2_ref, b2_ref,                  # fwd conv2
                        nt2_ref, nt1_ref,                # adjoint (tied) conv2 / conv1
                        pool_ref, poolt_ref,             # GAP matrices
                        wfct_ref, wfc_ref, bfc_ref,      # FC weights
                        out_ref,                         # (H, W*Cin)   relevance map
                        *, H, W, Cin, Cmid, NC, eps):
    f32 = jnp.float32

    def conv3(a, n_ref, bias=None):
        """3x3 'same' conv as 3 banded matmuls + sublane shifts of the results.

        a:      (H, W*Ci) unshifted operand (stays in vregs)
        n_ref:  (3, W*Ci, W*Co) banded weights, one per row offset (-1, 0, +1)
        """
        t0 = jnp.dot(a, n_ref[0], preferred_element_type=f32)   # contributes to row h+1
        t1 = jnp.dot(a, n_ref[1], preferred_element_type=f32)   # contributes to row h
        t2 = jnp.dot(a, n_ref[2], preferred_element_type=f32)   # contributes to row h-1
        rows = lax.broadcasted_iota(jnp.int32, t1.shape, 0)
        down = jnp.where(rows == 0, 0.0, pltpu.roll(t0, shift=1, axis=0))
        up = jnp.where(rows == H - 1, 0.0, pltpu.roll(t2, shift=H - 1, axis=0))
        z = t1 + down + up
        if bias is not None:
            z = z + bias
        return z

    def stab(v):                                   # LRP-epsilon stabilized denominator
        return v + eps * jnp.where(v >= 0.0, 1.0, -1.0)

    x = x_ref[...]

    # ---------------- tied-encoder forward (all in vregs) ----------------
    z1 = conv3(x, n1_ref, b1_ref[...])             # (H, W*Cmid)
    a1 = jnp.maximum(z1, 0.0)
    z2 = conv3(a1, n2_ref, b2_ref[...])            # (H, W*Cmid)
    a2 = jnp.maximum(z2, 0.0)

    # ---------------- head: GAP fwd + FC LRP-eps + GAP redistribution ----------------
    inv_hw = 1.0 / float(H * W)
    hsum = jnp.sum(a2, axis=0, keepdims=True)                                   # (1, W*Cmid)
    p = jnp.dot(hsum, pool_ref[...], preferred_element_type=f32) * inv_hw       # (1, Cmid)
    logits = jnp.dot(p, wfct_ref[...], preferred_element_type=f32) + bfc_ref[...]   # (1, NC)
    cls = cls_ref[pl.program_id(0)]
    onehot = (lax.broadcasted_iota(jnp.int32, logits.shape, 1) == cls).astype(f32)
    r = onehot * logits                            # class-selected relevance
    s_fc = r / stab(logits)
    cfac = jnp.dot(s_fc, wfc_ref[...], preferred_element_type=f32)              # (1, Cmid)
    r_p = p * cfac                                 # relevance on pooled features
    s_g = r_p / stab(p)                            # GAP epsilon rule
    sbc = jnp.dot(s_g, poolt_ref[...], preferred_element_type=f32)              # (1, W*Cmid)
    r_a2 = a2 * (sbc * inv_hw)                     # relevance on a2

    # ---------------- LRP-eps through conv2 (tied, transposed taps) ----------------
    s2 = r_a2 / stab(z2)
    r_a1 = a1 * conv3(s2, nt2_ref)                 # (H, W*Cmid)

    # ---------------- LRP-eps through conv1 ----------------
    s1 = r_a1 / stab(z1)
    # TODO(synk): output lane width is W*Cin=64 (<128); pack 2 batch elements per store
    # for fully unmasked vst when this is scaled up.
    out_ref[...] = x * conv3(s1, nt1_ref)          # (H, W*Cin)


# ------------------------------ pallas_call wrapper ----------------------------

def tied_weighted_decoder(x_nchw, class_idx, prep, epsilon=1e-8):
    """forward(x, class_idx): LRP-epsilon relevance map with tied encoder weights.

    x_nchw: (B, Cin, H, W) f32, class_idx: (B,) int32 -> (B, Cin, H, W) f32.
    epsilon default matches the PyTorch spec (1e-8).
    """
    x = jnp.transpose(x_nchw, (0, 2, 3, 1)).astype(jnp.float32)          # NHWC
    B, H, W, Cin = x.shape
    Cmid = prep["pool"].shape[1]
    NC = prep["wfc"].shape[0]
    xr = x.reshape(B, H, W * Cin)                  # lane axis = (w, c), free reshape

    kernel = functools.partial(_lrp_decoder_kernel, H=H, W=W, Cin=Cin,
                               Cmid=Cmid, NC=NC, eps=float(epsilon))

    def wspec(shape):                              # resident (constant-index) weight block
        return pl.BlockSpec(shape, lambda b, cls, _s=shape: (0,) * len(_s))

    r = pl.pallas_call(
        kernel,
        out_shape=jax.ShapeDtypeStruct((B, H, W * Cin), jnp.float32),
        grid_spec=pltpu.PrefetchScalarGridSpec(
            num_scalar_prefetch=1,                 # class_idx -> SMEM
            grid=(B,),
            in_specs=[
                pl.BlockSpec((None, H, W * Cin), lambda b, cls: (b, 0, 0)),
                wspec((3, W * Cin, W * Cmid)),     # n1
                wspec((1, W * Cmid)),              # bias row 1
                wspec((3, W * Cmid, W * Cmid)),    # n2
                wspec((1, W * Cmid)),              # bias row 2
                wspec((3, W * Cmid, W * Cmid)),    # nt2 (adjoint conv2)
                wspec((3, W * Cmid, W * Cin)),     # nt1 (adjoint conv1)
                wspec((W * Cmid, Cmid)),           # pool
                wspec((Cmid, W * Cmid)),           # poolt
                wspec((Cmid, NC)),                 # Wfc^T
                wspec((NC, Cmid)),                 # Wfc
                wspec((1, NC)),                    # bfc row
            ],
            out_specs=pl.BlockSpec((None, H, W * Cin), lambda b, cls: (b, 0, 0)),
        ),
        compiler_params=pltpu.CompilerParams(
            dimension_semantics=("parallel",),     # batch shards across v7x's 2 TCs
        ),
    )(class_idx.astype(jnp.int32), xr,
      prep["n1"], prep["brow1"], prep["n2"], prep["brow2"],
      prep["nt2"], prep["nt1"],
      prep["pool"], prep["poolt"], prep["wfct"], prep["wfc"], prep["bfcrow"])

    return jnp.transpose(r.reshape(B, H, W, Cin), (0, 3, 1, 2))          # back to NCHW


# ------------------------------ params / preprocessing -------------------------

def init_params(key, c_in=4, c_mid=8, num_classes=10):
    ks = jax.random.split(key, 6)
    return dict(
        W1=0.2 * jax.random.normal(ks[0], (3, 3, c_in, c_mid), jnp.float32),
        b1=0.05 * jax.random.normal(ks[1], (c_mid,), jnp.float32),
        W2=0.2 * jax.random.normal(ks[2], (3, 3, c_mid, c_mid), jnp.float32),
        b2=0.05 * jax.random.normal(ks[3], (c_mid,), jnp.float32),
        Wfc=0.2 * jax.random.normal(ks[4], (num_classes, c_mid), jnp.float32),
        bfc=0.05 * jax.random.normal(ks[5], (num_classes,), jnp.float32),
    )


def prepare_params(params, W):
    """One-time weight preprocessing hoisted out of the per-call path."""
    W1 = params["W1"].astype(jnp.float32)          # (3, 3, Cin, Cmid)
    b1 = params["b1"].astype(jnp.float32)
    W2 = params["W2"].astype(jnp.float32)          # (3, 3, Cmid, Cmid)
    b2 = params["b2"].astype(jnp.float32)
    Wfc = params["Wfc"].astype(jnp.float32)        # (NC, Cmid)
    bfc = params["bfc"].astype(jnp.float32)
    Cmid = W1.shape[3]

    def banded(Wk):
        """(3,3,Ci,Co) -> (3, W*Ci, W*Co): folds the column (lane) shift and the column
        zero-padding of a 3x3 'same' conv into banded weights, one per row offset."""
        return jnp.stack([
            sum(jnp.kron(jnp.eye(W, k=1 - j, dtype=jnp.float32), Wk[i, j])
                for j in range(3))
            for i in range(3)
        ])

    def adjoint(Wk):
        """Tied transposed-conv kernel: flip spatially, swap in/out channels."""
        return jnp.transpose(Wk[::-1, ::-1], (0, 1, 3, 2))

    return dict(
        n1=banded(W1),
        n2=banded(W2),
        nt2=banded(adjoint(W2)),
        nt1=banded(adjoint(W1)),
        brow1=jnp.tile(b1, W).reshape(1, W * Cmid),
        brow2=jnp.tile(b2, W).reshape(1, W * Cmid),
        pool=jnp.tile(jnp.eye(Cmid, dtype=jnp.float32), (W, 1)),     # (W*Cmid, Cmid)
        poolt=jnp.tile(jnp.eye(Cmid, dtype=jnp.float32), (1, W)),    # (Cmid, W*Cmid)
        wfct=Wfc.T,                                 # (Cmid, NC)
        wfc=Wfc,                                    # (NC, Cmid)
        bfcrow=bfc.reshape(1, -1),                  # (1, NC)
    )


# ------------------------------ demo / smoke test ------------------------------

if __name__ == "__main__":
    B, Cin, H, W = 2, 4, 16, 16
    C_mid, num_classes = 8, 10

    k_params, k_x = jax.random.split(jax.random.PRNGKey(0))
    params = init_params(k_params, c_in=Cin, c_mid=C_mid, num_classes=num_classes)
    prep = prepare_params(params, W)

    x = jax.random.normal(k_x, (B, Cin, H, W), jnp.float32)
    class_idx = jnp.array([1, 7], dtype=jnp.int32)

    fwd = jax.jit(tied_weighted_decoder)
    out = jax.block_until_ready(fwd(x, class_idx, prep))

    assert out.shape == (B, Cin, H, W)
    assert bool(jnp.all(jnp.isfinite(out)))
    print("KERNEL_OK")
</pallas_src>

<mosaic_0001>
module attributes {stable_mosaic.version = 11 : i64} {
  func.func @_lrp_decoder_kernel(%arg0: i32, %arg1: memref<2xi32, #tpu.memory_space<smem>>, %arg2: memref<1x16x64xf32, #tpu.memory_space<vmem>>, %arg3: memref<3x64x128xf32, #tpu.memory_space<vmem>>, %arg4: memref<1x128xf32, #tpu.memory_space<vmem>>, %arg5: memref<3x128x128xf32, #tpu.memory_space<vmem>>, %arg6: memref<1x128xf32, #tpu.memory_space<vmem>>, %arg7: memref<3x128x128xf32, #tpu.memory_space<vmem>>, %arg8: memref<3x128x64xf32, #tpu.memory_space<vmem>>, %arg9: memref<128x8xf32, #tpu.memory_space<vmem>>, %arg10: memref<8x128xf32, #tpu.memory_space<vmem>>, %arg11: memref<8x10xf32, #tpu.memory_space<vmem>>, %arg12: memref<10x8xf32, #tpu.memory_space<vmem>>, %arg13: memref<1x10xf32, #tpu.memory_space<vmem>>, %arg14: memref<1x16x64xf32, #tpu.memory_space<vmem>>) attributes {dimension_semantics = [#tpu.dimension_semantics<parallel>], iteration_bounds = array<i64: 2>, scalar_prefetch = 1 : i64, scratch_operands = 0 : i64, tpu.core_type = #tpu.core_type<tc>, window_params = [{transform_indices = @transform_0, window_bounds = array<i64: 1, 16, 64>}, {pipeline_mode = #tpu.pipeline_mode<synchronous>, transform_indices = @transform_1, window_bounds = array<i64: 3, 64, 128>}, {pipeline_mode = #tpu.pipeline_mode<synchronous>, transform_indices = @transform_2, window_bounds = array<i64: 1, 128>}, {pipeline_mode = #tpu.pipeline_mode<synchronous>, transform_indices = @transform_3, window_bounds = array<i64: 3, 128, 128>}, {pipeline_mode = #tpu.pipeline_mode<synchronous>, transform_indices = @transform_4, window_bounds = array<i64: 1, 128>}, {pipeline_mode = #tpu.pipeline_mode<synchronous>, transform_indices = @transform_5, window_bounds = array<i64: 3, 128, 128>}, {pipeline_mode = #tpu.pipeline_mode<synchronous>, transform_indices = @transform_6, window_bounds = array<i64: 3, 128, 64>}, {pipeline_mode = #tpu.pipeline_mode<synchronous>, transform_indices = @transform_7, window_bounds = array<i64: 128, 8>}, {pipeline_mode = #tpu.pipeline_mode<synchronous>, transform_indices = @transform_8, window_bounds = array<i64: 8, 128>}, {pipeline_mode = #tpu.pipeline_mode<synchronous>, transform_indices = @transform_9, window_bounds = array<i64: 8, 10>}, {pipeline_mode = #tpu.pipeline_mode<synchronous>, transform_indices = @transform_10, window_bounds = array<i64: 10, 8>}, {pipeline_mode = #tpu.pipeline_mode<synchronous>, transform_indices = @transform_11, window_bounds = array<i64: 1, 10>}, {transform_indices = @transform_12, window_bounds = array<i64: 1, 16, 64>}]} {
    %c0 = arith.constant 0 : index
    %c0_0 = arith.constant 0 : index
    %c0_1 = arith.constant 0 : index
    %0 = vector.load %arg2[%c0, %c0_0, %c0_1] : memref<1x16x64xf32, #tpu.memory_space<vmem>>, vector<1x16x64xf32>
    %1 = vector.shape_cast %0 : vector<1x16x64xf32> to vector<16x64xf32>
    %c0_2 = arith.constant 0 : index
    %c0_3 = arith.constant 0 : index
    %2 = vector.load %arg4[%c0_2, %c0_3] : memref<1x128xf32, #tpu.memory_space<vmem>>, vector<1x128xf32>
    %c0_4 = arith.constant 0 : index
    %c0_5 = arith.constant 0 : index
    %c0_6 = arith.constant 0 : index
    %3 = vector.load %arg3[%c0_4, %c0_5, %c0_6] : memref<3x64x128xf32, #tpu.memory_space<vmem>>, vector<1x64x128xf32>
    %4 = vector.shape_cast %3 : vector<1x64x128xf32> to vector<64x128xf32>
    %cst = arith.constant dense<0.000000e+00> : vector<16x128xf32>
    %5 = tpu.matmul %1, %4, %cst {dimension_numbers = #tpu.dot_dimension_numbers<[1], [0], [0], [1], [0, 0, 1, 1], [], []>} : vector<16x64xf32>, vector<64x128xf32>, vector<16x128xf32> -> vector<16x128xf32>
    %c1 = arith.constant 1 : index
    %c0_7 = arith.constant 0 : index
    %c0_8 = arith.constant 0 : index
    %6 = vector.load %arg3[%c1, %c0_7, %c0_8] : memref<3x64x128xf32, #tpu.memory_space<vmem>>, vector<1x64x128xf32>
    %7 = vector.shape_cast %6 : vector<1x64x128xf32> to vector<64x128xf32>
    %cst_9 = arith.constant dense<0.000000e+00> : vector<16x128xf32>
    %8 = tpu.matmul %1, %7, %cst_9 {dimension_numbers = #tpu.dot_dimension_numbers<[1], [0], [0], [1], [0, 0, 1, 1], [], []>} : vector<16x64xf32>, vector<64x128xf32>, vector<16x128xf32> -> vector<16x128xf32>
    %c2 = arith.constant 2 : index
    %c0_10 = arith.constant 0 : index
    %c0_11 = arith.constant 0 : index
    %9 = vector.load %arg3[%c2, %c0_10, %c0_11] : memref<3x64x128xf32, #tpu.memory_space<vmem>>, vector<1x64x128xf32>
    %10 = vector.shape_cast %9 : vector<1x64x128xf32> to vector<64x128xf32>
    %cst_12 = arith.constant dense<0.000000e+00> : vector<16x128xf32>
    %11 = tpu.matmul %1, %10, %cst_12 {dimension_numbers = #tpu.dot_dimension_numbers<[1], [0], [0], [1], [0, 0, 1, 1], [], []>} : vector<16x64xf32>, vector<64x128xf32>, vector<16x128xf32> -> vector<16x128xf32>
    %12 = tpu.iota {dimensions = array<i32: 0>} : vector<16x128xi32>
    %c0_i32 = arith.constant 0 : i32
    %13 = vector.broadcast %c0_i32 : i32 to vector<16x128xi32>
    %14 = arith.cmpi eq, %12, %13 : vector<16x128xi32>
    %c1_i32 = arith.constant 1 : i32
    %15 = tpu.dynamic_rotate %5 by %c1_i32 dim 0 : vector<16x128xf32>, i32 -> vector<16x128xf32>
    %cst_13 = arith.constant 0.000000e+00 : f32
    %16 = vector.broadcast %cst_13 : f32 to vector<16x128xf32>
    %17 = arith.select %14, %16, %15 : vector<16x128xi1>, vector<16x128xf32>
    %c15_i32 = arith.constant 15 : i32
    %18 = vector.broadcast %c15_i32 : i32 to vector<16x128xi32>
    %19 = arith.cmpi eq, %12, %18 : vector<16x128xi32>
    %c15_i32_14 = arith.constant 15 : i32
    %20 = tpu.dynamic_rotate %11 by %c15_i32_14 dim 0 : vector<16x128xf32>, i32 -> vector<16x128xf32>
    %cst_15 = arith.constant 0.000000e+00 : f32
    %21 = vector.broadcast %cst_15 : f32 to vector<16x128xf32>
    %22 = arith.select %19, %21, %20 : vector<16x128xi1>, vector<16x128xf32>
    %23 = arith.addf %8, %17 : vector<16x128xf32>
    %24 = arith.addf %23, %22 : vector<16x128xf32>
    %25 = vector.broadcast %2 : vector<1x128xf32> to vector<16x128xf32>
    %26 = arith.addf %24, %25 : vector<16x128xf32>
    %cst_16 = arith.constant 0.000000e+00 : f32
    %27 = vector.broadcast %cst_16 : f32 to vector<16x128xf32>
    %28 = arith.maximumf %26, %27 : vector<16x128xf32>
    %c0_17 = arith.constant 0 : index
    %c0_18 = arith.constant 0 : index
    %29 = vector.load %arg6[%c0_17, %c0_18] : memref<1x128xf32, #tpu.memory_space<vmem>>, vector<1x128xf32>
    %c0_19 = arith.constant 0 : index
    %c0_20 = arith.constant 0 : index
    %c0_21 = arith.constant 0 : index
    %30 = vector.load %arg5[%c0_19, %c0_20, %c0_21] : memref<3x128x128xf32, #tpu.memory_space<vmem>>, vector<1x128x128xf32>
    %31 = vector.shape_cast %30 : vector<1x128x128xf32> to vector<128x128xf32>
    %cst_22 = arith.constant dense<0.000000e+00> : vector<16x128xf32>
    %32 = tpu.matmul %28, %31, %cst_22 {dimension_numbers = #tpu.dot_dimension_numbers<[1], [0], [0], [1], [0, 0, 1, 1], [], []>} : vector<16x128xf32>, vector<128x128xf32>, vector<16x128xf32> -> vector<16x128xf32>
    %c1_23 = arith.constant 1 : index
    %c0_24 = arith.constant 0 : index
    %c0_25 = arith.constant 0 : index
    %33 = vector.load %arg5[%c1_23, %c0_24, %c0_25] : memref<3x128x128xf32, #tpu.memory_space<vmem>>, vector<1x128x128xf32>
    %34 = vector.shape_cast %33 : vector<1x128x128xf32> to vector<128x128xf32>
    %cst_26 = arith.constant dense<0.000000e+00> : vector<16x128xf32>
    %35 = tpu.matmul %28, %34, %cst_26 {dimension_numbers = #tpu.dot_dimension_numbers<[1], [0], [0], [1], [0, 0, 1, 1], [], []>} : vector<16x128xf32>, vector<128x128xf32>, vector<16x128xf32> -> vector<16x128xf32>
    %c2_27 = arith.constant 2 : index
    %c0_28 = arith.constant 0 : index
    %c0_29 = arith.constant 0 : index
    %36 = vector.load %arg5[%c2_27, %c0_28, %c0_29] : memref<3x128x128xf32, #tpu.memory_space<vmem>>, vector<1x128x128xf32>
    %37 = vector.shape_cast %36 : vector<1x128x128xf32> to vector<128x128xf32>
    %cst_30 = arith.constant dense<0.000000e+00> : vector<16x128xf32>
    %38 = tpu.matmul %28, %37, %cst_30 {dimension_numbers = #tpu.dot_dimension_numbers<[1], [0], [0], [1], [0, 0, 1, 1], [], []>} : vector<16x128xf32>, vector<128x128xf32>, vector<16x128xf32> -> vector<16x128xf32>
    %39 = tpu.iota {dimensions = array<i32: 0>} : vector<16x128xi32>
    %c0_i32_31 = arith.constant 0 : i32
    %40 = vector.broadcast %c0_i32_31 : i32 to vector<16x128xi32>
    %41 = arith.cmpi eq, %39, %40 : vector<16x128xi32>
    %c1_i32_32 = arith.constant 1 : i32
    %42 = tpu.dynamic_rotate %32 by %c1_i32_32 dim 0 : vector<16x128xf32>, i32 -> vector<16x128xf32>
    %cst_33 = arith.constant 0.000000e+00 : f32
    %43 = vector.broadcast %cst_33 : f32 to vector<16x128xf32>
    %44 = arith.select %41, %43, %42 : vector<16x128xi1>, vector<16x128xf32>
    %c15_i32_34 = arith.constant 15 : i32
    %45 = vector.broadcast %c15_i32_34 : i32 to vector<16x128xi32>
    %46 = arith.cmpi eq, %39, %45 : vector<16x128xi32>
    %c15_i32_35 = arith.constant 15 : i32
    %47 = tpu.dynamic_rotate %38 by %c15_i32_35 dim 0 : vector<16x128xf32>, i32 -> vector<16x128xf32>
    %cst_36 = arith.constant 0.000000e+00 : f32
    %48 = vector.broadcast %cst_36 : f32 to vector<16x128xf32>
    %49 = arith.select %46, %48, %47 : vector<16x128xi1>, vector<16x128xf32>
    %50 = arith.addf %35, %44 : vector<16x128xf32>
    %51 = arith.addf %50, %49 : vector<16x128xf32>
    %52 = vector.broadcast %29 : vector<1x128xf32> to vector<16x128xf32>
    %53 = arith.addf %51, %52 : vector<16x128xf32>
    %cst_37 = arith.constant 0.000000e+00 : f32
    %54 = vector.broadcast %cst_37 : f32 to vector<16x128xf32>
    %55 = arith.maximumf %53, %54 : vector<16x128xf32>
    %cst_38 = arith.constant dense<0.000000e+00> : vector<128xf32>
    %56 = vector.multi_reduction <add>, %55, %cst_38 [0] : vector<16x128xf32> to vector<128xf32>
    %57 = vector.shape_cast %56 : vector<128xf32> to vector<1x128xf32>
    %c0_39 = arith.constant 0 : index
    %c0_40 = arith.constant 0 : index
    %58 = vector.load %arg9[%c0_39, %c0_40] : memref<128x8xf32, #tpu.memory_space<vmem>>, vector<128x8xf32>
    %cst_41 = arith.constant dense<0.000000e+00> : vector<1x8xf32>
    %59 = tpu.matmul %57, %58, %cst_41 {dimension_numbers = #tpu.dot_dimension_numbers<[1], [0], [0], [1], [0, 0, 1, 1], [], []>} : vector<1x128xf32>, vector<128x8xf32>, vector<1x8xf32> -> vector<1x8xf32>
    %cst_42 = arith.constant 3.906250e-03 : f32
    %60 = vector.broadcast %cst_42 : f32 to vector<1x8xf32>
    %61 = arith.mulf %59, %60 : vector<1x8xf32>
    %c0_43 = arith.constant 0 : index
    %c0_44 = arith.constant 0 : index
    %62 = vector.load %arg11[%c0_43, %c0_44] : memref<8x10xf32, #tpu.memory_space<vmem>>, vector<8x10xf32>
    %cst_45 = arith.constant dense<0.000000e+00> : vector<1x10xf32>
    %63 = tpu.matmul %61, %62, %cst_45 {dimension_numbers = #tpu.dot_dimension_numbers<[1], [0], [0], [1], [0, 0, 1, 1], [], []>} : vector<1x8xf32>, vector<8x10xf32>, vector<1x10xf32> -> vector<1x10xf32>
    %c0_46 = arith.constant 0 : index
    %c0_47 = arith.constant 0 : index
    %64 = vector.load %arg13[%c0_46, %c0_47] : memref<1x10xf32, #tpu.memory_space<vmem>>, vector<1x10xf32>
    %65 = arith.addf %63, %64 : vector<1x10xf32>
    %66 = arith.index_cast %arg0 : i32 to index
    %67 = memref.load %arg1[%66] : memref<2xi32, #tpu.memory_space<smem>>
    %68 = tpu.iota {dimensions = array<i32: 1>} : vector<1x10xi32>
    %69 = vector.broadcast %67 : i32 to vector<1x10xi32>
    %70 = arith.cmpi eq, %68, %69 : vector<1x10xi32>
    %71 = arith.extui %70 : vector<1x10xi1> to vector<1x10xi32>
    %72 = arith.sitofp %71 : vector<1x10xi32> to vector<1x10xf32>
    %73 = arith.mulf %72, %65 : vector<1x10xf32>
    %cst_48 = arith.constant 0.000000e+00 : f32
    %74 = vector.broadcast %cst_48 : f32 to vector<1x10xf32>
    %75 = arith.cmpf oge, %65, %74 : vector<1x10xf32>
    %cst_49 = arith.constant 1.000000e+00 : f32
    %cst_50 = arith.constant -1.000000e+00 : f32
    %76 = vector.broadcast %cst_49 : f32 to vector<1x10xf32>
    %77 = vector.broadcast %cst_50 : f32 to vector<1x10xf32>
    %78 = arith.select %75, %76, %77 : vector<1x10xi1>, vector<1x10xf32>
    %cst_51 = arith.constant 9.99999993E-9 : f32
    %79 = vector.broadcast %cst_51 : f32 to vector<1x10xf32>
    %80 = arith.mulf %79, %78 : vector<1x10xf32>
    %81 = arith.addf %65, %80 : vector<1x10xf32>
    %82 = arith.divf %73, %81 : vector<1x10xf32>
    %c0_52 = arith.constant 0 : index
    %c0_53 = arith.constant 0 : index
    %83 = vector.load %arg12[%c0_52, %c0_53] : memref<10x8xf32, #tpu.memory_space<vmem>>, vector<10x8xf32>
    %cst_54 = arith.constant dense<0.000000e+00> : vector<1x8xf32>
    %84 = tpu.matmul %82, %83, %cst_54 {dimension_numbers = #tpu.dot_dimension_numbers<[1], [0], [0], [1], [0, 0, 1, 1], [], []>} : vector<1x10xf32>, vector<10x8xf32>, vector<1x8xf32> -> vector<1x8xf32>
    %85 = arith.mulf %61, %84 : vector<1x8xf32>
    %cst_55 = arith.constant 0.000000e+00 : f32
    %86 = vector.broadcast %cst_55 : f32 to vector<1x8xf32>
    %87 = arith.cmpf oge, %61, %86 : vector<1x8xf32>
    %cst_56 = arith.constant 1.000000e+00 : f32
    %cst_57 = arith.constant -1.000000e+00 : f32
    %88 = vector.broadcast %cst_56 : f32 to vector<1x8xf32>
    %89 = vector.broadcast %cst_57 : f32 to vector<1x8xf32>
    %90 = arith.select %87, %88, %89 : vector<1x8xi1>, vector<1x8xf32>
    %cst_58 = arith.constant 9.99999993E-9 : f32
    %91 = vector.broadcast %cst_58 : f32 to vector<1x8xf32>
    %92 = arith.mulf %91, %90 : vector<1x8xf32>
    %93 = arith.addf %61, %92 : vector<1x8xf32>
    %94 = arith.divf %85, %93 : vector<1x8xf32>
    %c0_59 = arith.constant 0 : index
    %c0_60 = arith.constant 0 : index
    %95 = vector.load %arg10[%c0_59, %c0_60] : memref<8x128xf32, #tpu.memory_space<vmem>>, vector<8x128xf32>
    %cst_61 = arith.constant dense<0.000000e+00> : vector<1x128xf32>
    %96 = tpu.matmul %94, %95, %cst_61 {dimension_numbers = #tpu.dot_dimension_numbers<[1], [0], [0], [1], [0, 0, 1, 1], [], []>} : vector<1x8xf32>, vector<8x128xf32>, vector<1x128xf32> -> vector<1x128xf32>
    %cst_62 = arith.constant 3.906250e-03 : f32
    %97 = vector.broadcast %cst_62 : f32 to vector<1x128xf32>
    %98 = arith.mulf %96, %97 : vector<1x128xf32>
    %99 = vector.broadcast %98 : vector<1x128xf32> to vector<16x128xf32>
    %100 = arith.mulf %55, %99 : vector<16x128xf32>
    %cst_63 = arith.constant 0.000000e+00 : f32
    %101 = vector.broadcast %cst_63 : f32 to vector<16x128xf32>
    %102 = arith.cmpf oge, %53, %101 : vector<16x128xf32>
    %cst_64 = arith.constant 1.000000e+00 : f32
    %cst_65 = arith.constant -1.000000e+00 : f32
    %103 = vector.broadcast %cst_64 : f32 to vector<16x128xf32>
    %104 = vector.broadcast %cst_65 : f32 to vector<16x128xf32>
    %105 = arith.select %102, %103, %104 : vector<16x128xi1>, vector<16x128xf32>
    %cst_66 = arith.constant 9.99999993E-9 : f32
    %106 = vector.broadcast %cst_66 : f32 to vector<16x128xf32>
    %107 = arith.mulf %106, %105 : vector<16x128xf32>
    %108 = arith.addf %53, %107 : vector<16x128xf32>
    %109 = arith.divf %100, %108 : vector<16x128xf32>
    %c0_67 = arith.constant 0 : index
    %c0_68 = arith.constant 0 : index
    %c0_69 = arith.constant 0 : index
    %110 = vector.load %arg7[%c0_67, %c0_68, %c0_69] : memref<3x128x128xf32, #tpu.memory_space<vmem>>, vector<1x128x128xf32>
    %111 = vector.shape_cast %110 : vector<1x128x128xf32> to vector<128x128xf32>
    %cst_70 = arith.constant dense<0.000000e+00> : vector<16x128xf32>
    %112 = tpu.matmul %109, %111, %cst_70 {dimension_numbers = #tpu.dot_dimension_numbers<[1], [0], [0], [1], [0, 0, 1, 1], [], []>} : vector<16x128xf32>, vector<128x128xf32>, vector<16x128xf32> -> vector<16x128xf32>
    %c1_71 = arith.constant 1 : index
    %c0_72 = arith.constant 0 : index
    %c0_73 = arith.constant 0 : index
    %113 = vector.load %arg7[%c1_71, %c0_72, %c0_73] : memref<3x128x128xf32, #tpu.memory_space<vmem>>, vector<1x128x128xf32>
    %114 = vector.shape_cast %113 : vector<1x128x128xf32> to vector<128x128xf32>
    %cst_74 = arith.constant dense<0.000000e+00> : vector<16x128xf32>
    %115 = tpu.matmul %109, %114, %cst_74 {dimension_numbers = #tpu.dot_dimension_numbers<[1], [0], [0], [1], [0, 0, 1, 1], [], []>} : vector<16x128xf32>, vector<128x128xf32>, vector<16x128xf32> -> vector<16x128xf32>
    %c2_75 = arith.constant 2 : index
    %c0_76 = arith.constant 0 : index
    %c0_77 = arith.constant 0 : index
    %116 = vector.load %arg7[%c2_75, %c0_76, %c0_77] : memref<3x128x128xf32, #tpu.memory_space<vmem>>, vector<1x128x128xf32>
    %117 = vector.shape_cast %116 : vector<1x128x128xf32> to vector<128x128xf32>
    %cst_78 = arith.constant dense<0.000000e+00> : vector<16x128xf32>
    %118 = tpu.matmul %109, %117, %cst_78 {dimension_numbers = #tpu.dot_dimension_numbers<[1], [0], [0], [1], [0, 0, 1, 1], [], []>} : vector<16x128xf32>, vector<128x128xf32>, vector<16x128xf32> -> vector<16x128xf32>
    %119 = tpu.iota {dimensions = array<i32: 0>} : vector<16x128xi32>
    %c0_i32_79 = arith.constant 0 : i32
    %120 = vector.broadcast %c0_i32_79 : i32 to vector<16x128xi32>
    %121 = arith.cmpi eq, %119, %120 : vector<16x128xi32>
    %c1_i32_80 = arith.constant 1 : i32
    %122 = tpu.dynamic_rotate %112 by %c1_i32_80 dim 0 : vector<16x128xf32>, i32 -> vector<16x128xf32>
    %cst_81 = arith.constant 0.000000e+00 : f32
    %123 = vector.broadcast %cst_81 : f32 to vector<16x128xf32>
    %124 = arith.select %121, %123, %122 : vector<16x128xi1>, vector<16x128xf32>
    %c15_i32_82 = arith.constant 15 : i32
    %125 = vector.broadcast %c15_i32_82 : i32 to vector<16x128xi32>
    %126 = arith.cmpi eq, %119, %125 : vector<16x128xi32>
    %c15_i32_83 = arith.constant 15 : i32
    %127 = tpu.dynamic_rotate %118 by %c15_i32_83 dim 0 : vector<16x128xf32>, i32 -> vector<16x128xf32>
    %cst_84 = arith.constant 0.000000e+00 : f32
    %128 = vector.broadcast %cst_84 : f32 to vector<16x128xf32>
    %129 = arith.select %126, %128, %127 : vector<16x128xi1>, vector<16x128xf32>
    %130 = arith.addf %115, %124 : vector<16x128xf32>
    %131 = arith.addf %130, %129 : vector<16x128xf32>
    %132 = arith.mulf %28, %131 : vector<16x128xf32>
    %cst_85 = arith.constant 0.000000e+00 : f32
    %133 = vector.broadcast %cst_85 : f32 to vector<16x128xf32>
    %134 = arith.cmpf oge, %26, %133 : vector<16x128xf32>
    %cst_86 = arith.constant 1.000000e+00 : f32
    %cst_87 = arith.constant -1.000000e+00 : f32
    %135 = vector.broadcast %cst_86 : f32 to vector<16x128xf32>
    %136 = vector.broadcast %cst_87 : f32 to vector<16x128xf32>
    %137 = arith.select %134, %135, %136 : vector<16x128xi1>, vector<16x128xf32>
    %cst_88 = arith.constant 9.99999993E-9 : f32
    %138 = vector.broadcast %cst_88 : f32 to vector<16x128xf32>
    %139 = arith.mulf %138, %137 : vector<16x128xf32>
    %140 = arith.addf %26, %139 : vector<16x128xf32>
    %141 = arith.divf %132, %140 : vector<16x128xf32>
    %c0_89 = arith.constant 0 : index
    %c0_90 = arith.constant 0 : index
    %c0_91 = arith.constant 0 : index
    %142 = vector.load %arg8[%c0_89, %c0_90, %c0_91] : memref<3x128x64xf32, #tpu.memory_space<vmem>>, vector<1x128x64xf32>
    %143 = vector.shape_cast %142 : vector<1x128x64xf32> to vector<128x64xf32>
    %cst_92 = arith.constant dense<0.000000e+00> : vector<16x64xf32>
    %144 = tpu.matmul %141, %143, %cst_92 {dimension_numbers = #tpu.dot_dimension_numbers<[1], [0], [0], [1], [0, 0, 1, 1], [], []>} : vector<16x128xf32>, vector<128x64xf32>, vector<16x64xf32> -> vector<16x64xf32>
    %c1_93 = arith.constant 1 : index
    %c0_94 = arith.constant 0 : index
    %c0_95 = arith.constant 0 : index
    %145 = vector.load %arg8[%c1_93, %c0_94, %c0_95] : memref<3x128x64xf32, #tpu.memory_space<vmem>>, vector<1x128x64xf32>
    %146 = vector.shape_cast %145 : vector<1x128x64xf32> to vector<128x64xf32>
    %cst_96 = arith.constant dense<0.000000e+00> : vector<16x64xf32>
    %147 = tpu.matmul %141, %146, %cst_96 {dimension_numbers = #tpu.dot_dimension_numbers<[1], [0], [0], [1], [0, 0, 1, 1], [], []>} : vector<16x128xf32>, vector<128x64xf32>, vector<16x64xf32> -> vector<16x64xf32>
    %c2_97 = arith.constant 2 : index
    %c0_98 = arith.constant 0 : index
    %c0_99 = arith.constant 0 : index
    %148 = vector.load %arg8[%c2_97, %c0_98, %c0_99] : memref<3x128x64xf32, #tpu.memory_space<vmem>>, vector<1x128x64xf32>
    %149 = vector.shape_cast %148 : vector<1x128x64xf32> to vector<128x64xf32>
    %cst_100 = arith.constant dense<0.000000e+00> : vector<16x64xf32>
    %150 = tpu.matmul %141, %149, %cst_100 {dimension_numbers = #tpu.dot_dimension_numbers<[1], [0], [0], [1], [0, 0, 1, 1], [], []>} : vector<16x128xf32>, vector<128x64xf32>, vector<16x64xf32> -> vector<16x64xf32>
    %151 = tpu.iota {dimensions = array<i32: 0>} : vector<16x64xi32>
    %c0_i32_101 = arith.constant 0 : i32
    %152 = vector.broadcast %c0_i32_101 : i32 to vector<16x64xi32>
    %153 = arith.cmpi eq, %151, %152 : vector<16x64xi32>
    %c1_i32_102 = arith.constant 1 : i32
    %154 = tpu.dynamic_rotate %144 by %c1_i32_102 dim 0 : vector<16x64xf32>, i32 -> vector<16x64xf32>
    %cst_103 = arith.constant 0.000000e+00 : f32
    %155 = vector.broadcast %cst_103 : f32 to vector<16x64xf32>
    %156 = arith.select %153, %155, %154 : vector<16x64xi1>, vector<16x64xf32>
    %c15_i32_104 = arith.constant 15 : i32
    %157 = vector.broadcast %c15_i32_104 : i32 to vector<16x64xi32>
    %158 = arith.cmpi eq, %151, %157 : vector<16x64xi32>
    %c15_i32_105 = arith.constant 15 : i32
    %159 = tpu.dynamic_rotate %150 by %c15_i32_105 dim 0 : vector<16x64xf32>, i32 -> vector<16x64xf32>
    %cst_106 = arith.constant 0.000000e+00 : f32
    %160 = vector.broadcast %cst_106 : f32 to vector<16x64xf32>
    %161 = arith.select %158, %160, %159 : vector<16x64xi1>, vector<16x64xf32>
    %162 = arith.addf %147, %156 : vector<16x64xf32>
    %163 = arith.addf %162, %161 : vector<16x64xf32>
    %164 = arith.mulf %1, %163 : vector<16x64xf32>
    %c0_107 = arith.constant 0 : index
    %c0_108 = arith.constant 0 : index
    %c0_109 = arith.constant 0 : index
    %165 = vector.load %arg14[%c0_107, %c0_108, %c0_109] : memref<1x16x64xf32, #tpu.memory_space<vmem>>, vector<1x16x64xf32>
    %166 = vector.shape_cast %165 : vector<1x16x64xf32> to vector<16x64xf32>
    %167 = vector.shape_cast %164 : vector<16x64xf32> to vector<1x16x64xf32>
    tpu.vector_store %arg14[%c0_107, %c0_108, %c0_109], %167 {strides = array<i32>} : memref<1x16x64xf32, #tpu.memory_space<vmem>>, vector<1x16x64xf32>,
    return
  }
  func.func @transform_0(%arg0: i32, %arg1: memref<2xi32, #tpu.memory_space<smem>>) -> (i32, i32, i32) {
    %c0_i32 = arith.constant 0 : i32
    %c0_i32_0 = arith.constant 0 : i32
    %c0_i32_1 = arith.constant 0 : i32
    return %arg0, %c0_i32, %c0_i32_0 : i32, i32, i32
  }
  func.func @transform_1(%arg0: i32, %arg1: memref<2xi32, #tpu.memory_space<smem>>) -> (i32, i32, i32) {
    %c0_i32 = arith.constant 0 : i32
    %c0_i32_0 = arith.constant 0 : i32
    %c0_i32_1 = arith.constant 0 : i32
    %c0_i32_2 = arith.constant 0 : i32
    return %c0_i32, %c0_i32_0, %c0_i32_1 : i32, i32, i32
  }
  func.func @transform_2(%arg0: i32, %arg1: memref<2xi32, #tpu.memory_space<smem>>) -> (i32, i32) {
    %c0_i32 = arith.constant 0 : i32
    %c0_i32_0 = arith.constant 0 : i32
    %c0_i32_1 = arith.constant 0 : i32
    return %c0_i32, %c0_i32_0 : i32, i32
  }
  func.func @transform_3(%arg0: i32, %arg1: memref<2xi32, #tpu.memory_space<smem>>) -> (i32, i32, i32) {
    %c0_i32 = arith.constant 0 : i32
    %c0_i32_0 = arith.constant 0 : i32
    %c0_i32_1 = arith.constant 0 : i32
    %c0_i32_2 = arith.constant 0 : i32
    return %c0_i32, %c0_i32_0, %c0_i32_1 : i32, i32, i32
  }
  func.func @transform_4(%arg0: i32, %arg1: memref<2xi32, #tpu.memory_space<smem>>) -> (i32, i32) {
    %c0_i32 = arith.constant 0 : i32
    %c0_i32_0 = arith.constant 0 : i32
    %c0_i32_1 = arith.constant 0 : i32
    return %c0_i32, %c0_i32_0 : i32, i32
  }
  func.func @transform_5(%arg0: i32, %arg1: memref<2xi32, #tpu.memory_space<smem>>) -> (i32, i32, i32) {
    %c0_i32 = arith.constant 0 : i32
    %c0_i32_0 = arith.constant 0 : i32
    %c0_i32_1 = arith.constant 0 : i32
    %c0_i32_2 = arith.constant 0 : i32
    return %c0_i32, %c0_i32_0, %c0_i32_1 : i32, i32, i32
  }
  func.func @transform_6(%arg0: i32, %arg1: memref<2xi32, #tpu.memory_space<smem>>) -> (i32, i32, i32) {
    %c0_i32 = arith.constant 0 : i32
    %c0_i32_0 = arith.constant 0 : i32
    %c0_i32_1 = arith.constant 0 : i32
    %c0_i32_2 = arith.constant 0 : i32
    return %c0_i32, %c0_i32_0, %c0_i32_1 : i32, i32, i32
  }
  func.func @transform_7(%arg0: i32, %arg1: memref<2xi32, #tpu.memory_space<smem>>) -> (i32, i32) {
    %c0_i32 = arith.constant 0 : i32
    %c0_i32_0 = arith.constant 0 : i32
    %c0_i32_1 = arith.constant 0 : i32
    return %c0_i32, %c0_i32_0 : i32, i32
  }
  func.func @transform_8(%arg0: i32, %arg1: memref<2xi32, #tpu.memory_space<smem>>) -> (i32, i32) {
    %c0_i32 = arith.constant 0 : i32
    %c0_i32_0 = arith.constant 0 : i32
    %c0_i32_1 = arith.constant 0 : i32
    return %c0_i32, %c0_i32_0 : i32, i32
  }
  func.func @transform_9(%arg0: i32, %arg1: memref<2xi32, #tpu.memory_space<smem>>) -> (i32, i32) {
    %c0_i32 = arith.constant 0 : i32
    %c0_i32_0 = arith.constant 0 : i32
    %c0_i32_1 = arith.constant 0 : i32
    return %c0_i32, %c0_i32_0 : i32, i32
  }
  func.func @transform_10(%arg0: i32, %arg1: memref<2xi32, #tpu.memory_space<smem>>) -> (i32, i32) {
    %c0_i32 = arith.constant 0 : i32
    %c0_i32_0 = arith.constant 0 : i32
    %c0_i32_1 = arith.constant 0 : i32
    return %c0_i32, %c0_i32_0 : i32, i32
  }
  func.func @transform_11(%arg0: i32, %arg1: memref<2xi32, #tpu.memory_space<smem>>) -> (i32, i32) {
    %c0_i32 = arith.constant 0 : i32
    %c0_i32_0 = arith.constant 0 : i32
    %c0_i32_1 = arith.constant 0 : i32
    return %c0_i32, %c0_i32_0 : i32, i32
  }
  func.func @transform_12(%arg0: i32, %arg1: memref<2xi32, #tpu.memory_space<smem>>) -> (i32, i32, i32) {
    %c0_i32 = arith.constant 0 : i32
    %c0_i32_0 = arith.constant 0 : i32
    %c0_i32_1 = arith.constant 0 : i32
    return %arg0, %c0_i32, %c0_i32_0 : i32, i32, i32
  }
}

</mosaic_0001>

<bundles_post_ra>
// kernel: tied_weighted_decoder.1
= control target key start
LH: loop header
LB: loop body
LE: loop exit
PB: predicated region body
PF: predicated region fallthrough
CT: control target
= control target key end

     0   :  { %s1508_s28 = smov [#allocation3]   ;;  %s2197_s0 = inlined_call_operand.vmem [shape: s32[2], index: 0, kind: input, shape index: {}]   ;;  %s2198_s1 = inlined_call_operand.vmem [shape: f32[2,16,64], index: 1, kind: input, shape index: {}]   ;;  %s2199_s2 = inlined_call_operand.vmem [shape: f32[3,64,128], index: 2, kind: input, shape index: {}]   ;;  %s2200_s3 = inlined_call_operand.vmem [shape: f32[1,128], index: 3, kind: input, shape index: {}]   ;;  %s2201_s4 = inlined_call_operand.vmem [shape: f32[3,128,128], index: 4, kind: input, shape index: {}]   ;;  %s2202_s5 = inlined_call_operand.vmem [shape: f32[1,128], index: 5, kind: input, shape index: {}]   ;;  %s2203_s6 = inlined_call_operand.hbm [shape: f32[3,128,128], index: 6, kind: input, shape index: {}]   ;;  %s2204_s7 = inlined_call_operand.vmem [shape: f32[3,128,64], index: 7, kind: input, shape index: {}]   ;;  %s2205_s8 = inlined_call_operand.vmem [shape: f32[128,8], index: 8, kind: input, shape index: {}]   ;;  %s2206_s9 = inlined_call_operand.vmem [shape: f32[8,128], index: 9, kind: input, shape index: {}]   ;;  %s2207_s10 = inlined_call_operand.vmem [shape: f32[8,10], index: 10, kind: input, shape index: {}]   ;;  %s2208_s11 = inlined_call_operand.vmem [shape: f32[10,8], index: 11, kind: input, shape index: {}]   ;;  %s2209_s12 = inlined_call_operand.vmem [shape: f32[1,10], index: 12, kind: input, shape index: {}]   ;;  %s2210_s13 = inlined_call_operand.vmem [shape: f32[2,16,64], index: 13, kind: output, shape index: {}]  }
   0x1   :  { %s19_s27 = sshll.u32 %s2197_s0, 4  ;;  %s20_s27 = int_to_ptr.vmem [resolvable:$true] %s19_s27 }
   0x2   :  { %22 = dma.vmem_to_smem %s20_s27, 16, %s1508_s28, [#allocation2] }
   0x3   :  { %1498 = dma.done.wait [#allocation2], 16 }
   0x4   :  { %1499 = vsyncadd [#allocation2], 4294967280 }
   0x5   :  { %25 = sfence }
   0x6   :  { %26 = vsyncpa [#allocation5], 0  ;;  %s1587_s29 = smov 0  }
   0x7 LB: > { %s343_s0 = sshll.u32 %s2203_s6, 4  ;;  %s1596_s15 = sadd.s32 4294967295, %s1506_s29   ;;  %s1506_s29 = sphi %s1587_s29, %s32_s29   ;;  %s344_s0 = int_to_ptr.hbm [resolvable:$true] %s343_s0 }
   0x8   : > { %p1308_p0 = scmp.ge.s32.totalorder %s1506_s29, 1  ;;  %p320_p1 = scmp.lt.s32.totalorder %s1506_s29, 3 }
   0x9   : > { %p1420_p2 = scmp.eq.s32.totalorder %s1596_s15, 0  ;;  %s1509_s16 = smov [#allocation4]  }
   0xa   : > { %p321_p3 = pnand %p1308_p0, %p320_p1  ;;  %s345_s17 = sshll.u32 %s1509_s16, 4  ;;  %s346_s17 = int_to_ptr.vmem [resolvable:$true] %s345_s17 }
   0xb   : > { %s1510_s18 = smov 128   ;;  %s1511_s19 = smov 8  }
   0xc   : > { %p1416_p4 = pneg %p321_p3  ;;  %387 = sbr.rel (%p321_p3) target bundleno = 1222 (0x4c6), region = 68 }
   0xe   : > { %p1417_p5 = pnand %p1420_p2, %p1416_p4 }
  0x10   : > { %1419 = dma.hbm_to_vmem [thread:$0]  (!%p1417_p5), %s344_s0, 6144, %s346_s17, [#allocation5], %s1510_s18, %s1510_s18, %s1511_s19  }
  0x11   : > { %1501 = dma.done.wait (%p1420_p2), [#allocation5], 6144  }
  0x12   : > { %1503 = vsyncadd (%p1420_p2), [#allocation5], 4294961152  ;;  %p430_p6 = scmp.lt.s32.totalorder %s1596_s15, 1  ;;  %v450_v0 = vld [vmem:[%s2199_s2 + $0x38] sm:$0xff]  ;;  %v449_v2 = vld [vmem:[%s2199_s2 + $0x30] sm:$0xff]  ;;  %vm451_vm0 = vcmask 523264  }
  0x13   : > { %v1334_v1 = vld [vmem:[%s2199_s2 + $0xb8] sm:$0xff]  ;;  %466 = vmatpush.msra.mxu2 %v450_v0  ;;  %v1333_v3 = vld [vmem:[%s2199_s2 + $0xb0] sm:$0xff]  ;;  %v448_v4 = vld [vmem:[%s2199_s2 + $0x28] sm:$0xff]  ;;  %vm762_vm5 = vcmask 64512   ;;  %vm819_vm6 = vcmask 1041408   ;;  %s786_s30 = sld [smem:[#allocation3 + %s1596_s15]] }
  0x14   : > { %507 = vmatpush.msra.mxu3 %v1334_v1  ;;  %v1332_v5 = vld [vmem:[%s2199_s2 + $0xa8] sm:$0xff]  ;;  %s1621_s16 = scalar_select %p430_p6, %s1596_s15, 1  ;;  %v447_v6 = vld [vmem:[%s2199_s2 + $0x20] sm:$0xff]  ;;  %v446_v8 = vld [vmem:[%s2199_s2 + $0x18] sm:$0xff]  ;;  %vm815_vm13 = vcmask 80896  }
  0x15   : > { %467 = vmatpush.msra.mxu2 %v449_v2  ;;  %v1331_v7 = vld [vmem:[%s2199_s2 + $0xa0] sm:$0xff]  ;;  %v1330_v9 = vld [vmem:[%s2199_s2 + $0x98] sm:$0xff]  ;;  %v445_v10 = vld [vmem:[%s2199_s2 + $0x10] sm:$0xff] }
  0x16   : > { %508 = vmatpush.msra.mxu3 %v1333_v3  ;;  %s1410_s25 = sshll.u32 %s1621_s16, 4  ;;  %v1329_v11 = vld [vmem:[%s2199_s2 + $0x90] sm:$0xff]  ;;  %v444_v12 = vld [vmem:[%s2199_s2 + $0x8] sm:$0xff]  ;;  %v1370_v13 = vld [vmem:[%s2201_s4 + $0x178] sm:$0xff] }
  0x17   : > { %468 = vmatpush.msra.mxu2 %v448_v4  ;;  %v1354_v14 = vld [vmem:[%s2201_s4 + $0xf8] sm:$0xff]  ;;  %v1328_v15 = vld [vmem:[%s2199_s2 + $0x88] sm:$0xff]  ;;  %s1659_s26 = scalar_lea.vmem %s2198_s1, %s1410_s25  ;;  %649 = vmatpush.msra.mxu0 %v1370_v13  ;;  %v1369_v16 = vld [vmem:[%s2201_s4 + $0x170] sm:$0xff]  ;;  %s439_s15 = scalar_lea.vmem %s2210_s13, %s1410_s25 }
  0x18   : > { %509 = vmatpush.msra.mxu3 %v1332_v5  ;;  %684 = vmatpush.msra.mxu1 %v1354_v14  ;;  %v1353_v17 = vld [vmem:[%s2201_s4 + $0xf0] sm:$0xff]  ;;  %v1368_v18 = vld [vmem:[%s2201_s4 + $0x168] sm:$0xff]  ;;  %v443_v20 = vld [vmem:[%s2199_s2] sm:$0xff] }
  0x19   : > { %469 = vmatpush.msra.mxu2 %v447_v6  ;;  %v1352_v19 = vld [vmem:[%s2201_s4 + $0xe8] sm:$0xff]  ;;  %v1327_v21 = vld [vmem:[%s2199_s2 + $0x80] sm:$0xff]  ;;  %650 = vmatpush.msra.mxu0 %v1369_v16  ;;  %v1326_v23 = vld [vmem:[%s2199_s2 + $0x78] sm:$0xff] }
  0x1a   : > { %510 = vmatpush.msra.mxu3 %v1331_v7  ;;  %685 = vmatpush.msra.mxu1 %v1353_v17  ;;  %v440_v22 = vld [vmem:[%s1659_s26] sm:$0xff]  ;;  %v591_v24 = vld [vmem:[%s2201_s4 + $0x78] sm:$0xff]  ;;  %v1325_v25 = vld [vmem:[%s2199_s2 + $0x70] sm:$0xff] }
  0x1b   : > { %470 = vmatpush.msra.mxu2 %v446_v8  ;;  %651 = vmatpush.msra.mxu0 %v1368_v18  ;;  %v590_v26 = vld [vmem:[%s2201_s4 + $0x70] sm:$0xff]  ;;  %v1324_v27 = vld [vmem:[%s2199_s2 + $0x68] sm:$0xff]  ;;  %v1323_v29 = vld [vmem:[%s2199_s2 + $0x60] sm:$0xff] }
  0x1c   : > { %511 = vmatpush.msra.mxu3 %v1330_v9  ;;  %686 = vmatpush.msra.mxu1 %v1352_v19  ;;  %v589_v28 = vld [vmem:[%s2201_s4 + $0x68] sm:$0xff]  ;;  %v1322_v31 = vld [vmem:[%s2199_s2 + $0x58] sm:$0xff]  ;;  %v1321_v32 = vld [vmem:[%s2199_s2 + $0x50] sm:$0xff] }
  0x1d   : > { %471 = vmatpush.msra.mxu2 %v445_v10  ;;  %v441_v30 = vld [vmem:[%s1659_s26 + $0x8] sm:$0xff]  ;;  %v1319_v34 = vld [vmem:[%s2199_s2 + $0x40] sm:$0xff]  ;;  %v587_v38 = vld [vmem:[%s2201_s4 + $0x58] sm:$0xff] }
  0x1e   : > { %512 = vmatpush.msra.mxu3 %v1329_v11  ;;  %v1320_v33 = vld [vmem:[%s2199_s2 + $0x48] sm:$0xff]  ;;  %v588_v35 = vld [vmem:[%s2201_s4 + $0x60] sm:$0xff]  ;;  %v1366_v39 = vld [vmem:[%s2201_s4 + $0x158] sm:$0xff] }
  0x1f   : > { %472 = vmatpush.msra.mxu2 %v444_v12  ;;  %v1367_v36 = vld [vmem:[%s2201_s4 + $0x160] sm:$0xff]  ;;  %v1350_v40 = vld [vmem:[%s2201_s4 + $0xd8] sm:$0xff]  ;;  %v586_v41 = vld [vmem:[%s2201_s4 + $0x50] sm:$0xff]  ;;  %v522_v12 = vlaneseq }
  0x20   : > { %513 = vmatpush.msra.mxu3 %v1328_v15  ;;  %v1351_v37 = vld [vmem:[%s2201_s4 + $0xe0] sm:$0xff]  ;;  %652 = vmatpush.msra.mxu0 %v1367_v36  ;;  %v1365_v42 = vld [vmem:[%s2201_s4 + $0x150] sm:$0xff]  ;;  %v585_v44 = vld [vmem:[%s2201_s4 + $0x48] sm:$0xff] }
  0x21   : > { %473 = vmatpush.msra.mxu2 %v443_v20  ;;  %687 = vmatpush.msra.mxu1 %v1351_v37  ;;  %v1349_v43 = vld [vmem:[%s2201_s4 + $0xd0] sm:$0xff]  ;;  %v1364_v45 = vld [vmem:[%s2201_s4 + $0x148] sm:$0xff]  ;;  %v584_v47 = vld [vmem:[%s2201_s4 + $0x40] sm:$0xff]  ;;  %v1838_v13 = vshrl.u32 %v522_v12, 7 }
  0x22   : > { %514 = vmatpush.msra.mxu3 %v1327_v21  ;;  %1317 = vmatmul.msk.f32.vlgmr.msra.gmra.mxu2 %vm451_vm0, %v440_v22  ;;  %v1348_v46 = vld [vmem:[%s2201_s4 + $0xc8] sm:$0xff]  ;;  %v1363_v48 = vld [vmem:[%s2201_s4 + $0x140] sm:$0xff]  ;;  %v583_v50 = vld [vmem:[%s2201_s4 + $0x38] sm:$0xff] }
  0x23   : > { %1335 = vmatmul.msk.f32.vlgmr.msra.gmra.mxu3 %vm451_vm0, %v440_v22  ;;  %551 = vmatpush.msrb.mxu2 %v1326_v23  ;;  %v1347_v49 = vld [vmem:[%s2201_s4 + $0xc0] sm:$0xff]  ;;  %v1362_v51 = vld [vmem:[%s2201_s4 + $0x138] sm:$0xff]  ;;  %v582_v53 = vld [vmem:[%s2201_s4 + $0x30] sm:$0xff]  ;;  %vm529_vm1 = vcmp.lt.s32.totalorder %v1838_v13, 1  ;;  %vm525_vm2 = vcmp.eq.s32.totalorder %v1838_v13, 0  ;;  %vm538_vm3 = vcmp.lt.s32.totalorder %v1838_v13, 7 }
  0x24   : > { %592 = vmatpush.msrb.mxu3 %v591_v24  ;;  %653 = vmatpush.msra.mxu0 %v1366_v39  ;;  %v1346_v52 = vld [vmem:[%s2201_s4 + $0xb8] sm:$0xff]  ;;  %v1361_v54 = vld [vmem:[%s2201_s4 + $0x130] sm:$0xff]  ;;  %v581_v56 = vld [vmem:[%s2201_s4 + $0x28] sm:$0xff] }
  0x25   : > { %552 = vmatpush.msrb.mxu2 %v1325_v25  ;;  %688 = vmatpush.msra.mxu1 %v1350_v40  ;;  %v1345_v55 = vld [vmem:[%s2201_s4 + $0xb0] sm:$0xff]  ;;  %v1360_v57 = vld [vmem:[%s2201_s4 + $0x128] sm:$0xff]  ;;  %v580_v59 = vld [vmem:[%s2201_s4 + $0x20] sm:$0xff] }
  0x26   : > { %593 = vmatpush.msrb.mxu3 %v590_v26  ;;  %654 = vmatpush.msra.mxu0 %v1365_v42  ;;  %v1344_v58 = vld [vmem:[%s2201_s4 + $0xa8] sm:$0xff]  ;;  %v1359_v60 = vld [vmem:[%s2201_s4 + $0x120] sm:$0xff]  ;;  %v579_v62 = vld [vmem:[%s2201_s4 + $0x18] sm:$0xff] }
  0x27   : > { %553 = vmatpush.msrb.mxu2 %v1324_v27  ;;  %689 = vmatpush.msra.mxu1 %v1349_v43  ;;  %v1343_v61 = vld [vmem:[%s2201_s4 + $0xa0] sm:$0xff]  ;;  %v1358_v63 = vld [vmem:[%s2201_s4 + $0x118] sm:$0xff]  ;;  %v578_v1 = vld [vmem:[%s2201_s4 + $0x10] sm:$0xff]  ;;  %v1853_v27 = vadd.s32 8, %v1838_v13 }
  0x28   : > { %594 = vmatpush.msrb.mxu3 %v589_v28  ;;  %655 = vmatpush.msra.mxu0 %v1364_v45  ;;  %v1342_v0 = vld [vmem:[%s2201_s4 + $0x98] sm:$0xff]  ;;  %v1357_v2 = vld [vmem:[%s2201_s4 + $0x110] sm:$0xff]  ;;  %v577_v4 = vld [vmem:[%s2201_s4 + $0x8] sm:$0xff] }
  0x29   : > { %554 = vmatpush.msrb.mxu2 %v1323_v29  ;;  %690 = vmatpush.msra.mxu1 %v1348_v46  ;;  %v1341_v3 = vld [vmem:[%s2201_s4 + $0x90] sm:$0xff]  ;;  %v1356_v5 = vld [vmem:[%s2201_s4 + $0x108] sm:$0xff]  ;;  %v576_v7 = vld [vmem:[%s2201_s4] sm:$0xff]  ;;  %vm535_vm4 = vcmp.eq.s32.totalorder %v1853_v27, 15 }
  0x2a   : > { %1318 = vmatmul.msk.f32.gmra.mxu2 %vm451_vm0, %v441_v30  ;;  %595 = vmatpush.msrb.mxu3 %v588_v35  ;;  %v1340_v6 = vld [vmem:[%s2201_s4 + $0x88] sm:$0xff]  ;;  %v1355_v8 = vld [vmem:[%s2201_s4 + $0x100] sm:$0xff]  ;;  %v737_v39 = vld [vmem:[%s2205_s8 + $0x70] sm:$0xff] }
  0x2b   : > { %1336 = vmatmul.msk.f32.gmra.mxu3 %vm451_vm0, %v441_v30  ;;  %555 = vmatpush.msrb.mxu2 %v1322_v31  ;;  %v1339_v9 = vld [vmem:[%s2201_s4 + $0x80] sm:$0xff]  ;;  %v736_v40 = vld [vmem:[%s2205_s8 + $0x68] sm:$0xff]  ;;  %v734_v42 = vld [vmem:[%s2205_s8 + $0x58] sm:$0xff] }
  0x2c   : > { %596 = vmatpush.msrb.mxu3 %v587_v38  ;;  %656 = vmatpush.msra.mxu0 %v1363_v48  ;;  %v1436_v24 = vld [vmem:[%s2200_s3] ss:$0 sm:$0xff]  ;;  %v738_v38 = vld [vmem:[%s2205_s8 + $0x78] sm:$0xff]  ;;  %v733_v43 = vld [vmem:[%s2205_s8 + $0x50] sm:$0xff] }
  0x2d   : > { %556 = vmatpush.msrb.mxu2 %v1321_v32  ;;  %691 = vmatpush.msra.mxu1 %v1347_v49  ;;  %v731_v45 = vld [vmem:[%s2205_s8 + $0x40] sm:$0xff]  ;;  %v730_v46 = vld [vmem:[%s2205_s8 + $0x38] sm:$0xff]  ;;  %v728_v48 = vld [vmem:[%s2205_s8 + $0x28] sm:$0xff] }
  0x2e   : > { %597 = vmatpush.msrb.mxu3 %v586_v41  ;;  %657 = vmatpush.msra.mxu0 %v1362_v51  ;;  %v735_v41 = vld [vmem:[%s2205_s8 + $0x60] sm:$0xff]  ;;  %v726_v51 = vld [vmem:[%s2205_s8 + $0x18] sm:$0xff] }
  0x2f   : > { %557 = vmatpush.msrb.mxu2 %v1320_v33  ;;  %692 = vmatpush.msra.mxu1 %v1346_v52  ;;  %v727_v49 = vld [vmem:[%s2205_s8 + $0x20] sm:$0xff]  ;;  %v725_v52 = vld [vmem:[%s2205_s8 + $0x10] sm:$0xff] }
  0x30   : > { %598 = vmatpush.msrb.mxu3 %v585_v44  ;;  %658 = vmatpush.msra.mxu0 %v1361_v54  ;;  %v732_v44 = vld [vmem:[%s2205_s8 + $0x48] sm:$0xff] }
  0x31   : > { %558 = vmatpush.msrb.mxu2 %v1319_v34  ;;  %693 = vmatpush.msra.mxu1 %v1345_v55  ;;  %v723_v55 = vld [vmem:[%s2205_s8] sm:$0xff] }
  0x32   : > { %1337 = vmatmul.msk.f32.vlgmr.msrb.gmra.mxu2 %vm451_vm0, %v440_v22  ;;  %599 = vmatpush.msrb.mxu3 %v584_v47  ;;  %v729_v47 = vld [vmem:[%s2205_s8 + $0x30] sm:$0xff] }
  0x33   : > { %659 = vmatpush.msra.mxu0 %v1360_v57  ;;  %694 = vmatpush.msra.mxu1 %v1344_v58  ;;  %v760_v58 = vld [vmem:[%s2207_s10] sm:$0xff] }
  0x34   : > { %600 = vmatpush.msrb.mxu3 %v583_v50  ;;  %739 = vmatpush.msra.mxu2 %v738_v38  ;;  %v1512_v38 = vmov -1.0  }
  0x35   : > { %660 = vmatpush.msra.mxu0 %v1359_v60  ;;  %695 = vmatpush.msra.mxu1 %v1343_v61 }
  0x36   : > { %601 = vmatpush.msrb.mxu3 %v582_v53  ;;  %740 = vmatpush.msra.mxu2 %v737_v39  ;;  %v724_v53 = vld [vmem:[%s2205_s8 + $0x8] sm:$0xff] }
  0x37   : > { %661 = vmatpush.msra.mxu0 %v1358_v63  ;;  %696 = vmatpush.msra.mxu1 %v1342_v0 }
  0x38   : > { %602 = vmatpush.msrb.mxu3 %v581_v56  ;;  %741 = vmatpush.msra.mxu2 %v736_v40 }
  0x39   : > { %662 = vmatpush.msra.mxu0 %v1357_v2  ;;  %697 = vmatpush.msra.mxu1 %v1341_v3 }
  0x3a   : > { %1338 = vmatmul.msk.f32.gmra.mxu2 %vm451_vm0, %v441_v30  ;;  %603 = vmatpush.msrb.mxu3 %v580_v59 }
  0x3b   : > { %663 = vmatpush.msra.mxu0 %v1356_v5  ;;  %698 = vmatpush.msra.mxu1 %v1340_v6  ;;  %v1437_v6 = vld [vmem:[%s2202_s5] ss:$0 sm:$0xff] }
  0x3c   : > { %604 = vmatpush.msrb.mxu3 %v579_v62  ;;  %742 = vmatpush.msra.mxu2 %v735_v41 }
  0x3d   : > { %664 = vmatpush.msra.mxu0 %v1355_v8  ;;  %699 = vmatpush.msra.mxu1 %v1339_v9 }
  0x3e   : > { %605 = vmatpush.msrb.mxu3 %v578_v1  ;;  %743 = vmatpush.msra.mxu2 %v734_v42  ;;  %v788_v42 = vand.u32 127, %v522_v12 }
  0x40   : > { %606 = vmatpush.msrb.mxu3 %v577_v4  ;;  %744 = vmatpush.msra.mxu2 %v733_v43 }
  0x42   : > { %607 = vmatpush.msrb.mxu3 %v576_v7  ;;  %745 = vmatpush.msra.mxu2 %v732_v44  ;;  %v789_v44 = vstv %s786_s30 }
  0x43   : > { %vm790_vm8 = vcmp.eq.s32.totalorder %v788_v42, %v789_v44  ;;  %v991_v44 = vld [vmem:[#allocation4 + $0x128] sm:$0xff] }
  0x44   : > { %746 = vmatpush.msra.mxu2 %v731_v45  ;;  %781 = vmatpush.msra.mxu3 %v760_v58 }
  0x46   : > { %747 = vmatpush.msra.mxu2 %v730_v46 }
  0x48   : > { %748 = vmatpush.msra.mxu2 %v729_v47 }
  0x4a   : > { %749 = vmatpush.msra.mxu2 %v728_v48 }
  0x4c   : > { %750 = vmatpush.msra.mxu2 %v727_v49 }
  0x4e   : > { %751 = vmatpush.msra.mxu2 %v726_v51 }
  0x50   : > { %752 = vmatpush.msra.mxu2 %v725_v52 }
  0x52   : > { %753 = vmatpush.msra.mxu2 %v724_v53 }
  0x54   : > { %754 = vmatpush.msra.mxu2 %v723_v55 }
  0xa5   : > { %v475_v10 = vpop.f32.mrf.mxu2 }
  0xa6   : > { %v516_v11 = vpop.f32.mrf.mxu3  ;;  %v527_v16 = vrot.slane %v475_v10, 7 }
  0xa7   : > { %v536_v19 = vrot.slane %v516_v11, 1 }
  0xad   : > { %v478_v14 = vpop.f32.mrf.mxu2 }
  0xae   : > { %v528_v15 = vrot.slane %v478_v14, 7  ;;  %v519_v17 = vpop.f32.mrf.mxu3 }
  0xaf   : > { %v537_v20 = vrot.slane %v519_v17, 1 }
  0xb0   : > { %v531_v18 = vsel %vm529_vm1, %v528_v15, %v527_v16  ;;  %v530_v31 = vsel %vm529_vm1, %v527_v16, %v528_v15 }
  0xb1   : > { %v532_v21 = vsel %vm525_vm2, 0.0, %v531_v18  ;;  %v539_v25 = vsel %vm538_vm3, %v536_v19, %v537_v20  ;;  %v540_v29 = vsel %vm538_vm3, %v537_v20, %v536_v19 }
  0xb2   : > { %v542_v34 = vsel %vm535_vm4, 0.0, %v540_v29  ;;  %v814_v29 = vld [vmem:[%s2208_s11 + $0x8] sm:$0x3] }
  0xb3   : > { %1373 = vmatpush.msk.msrb.mxu2 %vm819_vm6, %v814_v29  ;;  %v994_v29 = vld [vmem:[#allocation4 + $0x140] sm:$0xff] }
  0xb5   : > { %v560_v22 = vpop.f32.mrf.mxu2 }
  0xb6   : > { %v561_v23 = vadd.f32 %v560_v22, %v532_v21 }
  0xb8   : > { %v566_v26 = vadd.f32 %v561_v23, %v539_v25 }
  0xba   : > { %v1855_v28 = vadd.f32 %v1436_v24, %v566_v26 }
  0xbc   : > { %v1861_v30 = vmax.f32 %v1855_v28, 0.0 }
  0xbd   : > { %v563_v32 = vpop.f32.mrf.mxu2 }
  0xbe   : > { %v564_v33 = vadd.f32 %v563_v32, %v530_v31  ;;  %608 = vmatmul.f32.vlgmr.msrb.gmra.mxu3 %v1861_v30  ;;  %665 = vmatmul.f32.vlgmr.msra.gmra.mxu0 %v1861_v30  ;;  %v813_v31 = vld [vmem:[%s2208_s11] sm:$0xff] }
  0xbf   : > { %700 = vmatmul.f32.vlgmr.msra.gmra.mxu1 %v1861_v30  ;;  %838 = vmatpush.msrb.mxu2 %v813_v31  ;;  %v863_v32 = vld [vmem:[%s2206_s9] sm:$0xff] }
  0xc0   : > { %v567_v35 = vadd.f32 %v564_v33, %v542_v34  ;;  %882 = vmatpush.msrb.mxu3 %v863_v32  ;;  %v761_v33 = vld [vmem:[%s2209_s12] sm:$0x1] }
  0xc1   : > { %v977_v31 = vld [vmem:[#allocation4 + $0xc0] sm:$0xff] }
  0xc2   : > { %v1870_v36 = vadd.f32 %v1436_v24, %v567_v35 }
  0xc4   : > { %v1873_v37 = vmax.f32 %v1870_v36, 0.0 }
  0xc6   : > { %611 = vmatmul.f32.gmra.mxu3 %v1873_v37  ;;  %668 = vmatmul.f32.gmra.mxu0 %v1873_v37 }
  0xc7   : > { %703 = vmatmul.f32.gmra.mxu1 %v1873_v37 }
 0x13b   : > { %v666_v50 = vpop.f32.mrf.mxu0 }
 0x13c   : > { %v701_v56 = vpop.f32.mrf.mxu1  ;;  %v678_v60 = vrot.slane %v666_v50, 1  ;;  %v1513_v50 = vmov 0.0  }
 0x13d   : > { %v1372_v51 = vsel %vm790_vm8, 1.0, %v1513_v50 }
 0x141   : > { %v609_v54 = vpop.f32.mrf.mxu3 }
 0x142   : > { %v672_v62 = vrot.slane %v609_v54, 7 }
 0x143   : > { %v669_v57 = vpop.f32.mrf.mxu0 }
 0x144   : > { %v679_v59 = vrot.slane %v669_v57, 1  ;;  %v704_v1 = vpop.f32.mrf.mxu1 }
 0x146   : > { %v681_v0 = vsel %vm538_vm3, %v679_v59, %v678_v60  ;;  %v680_v9 = vsel %vm538_vm3, %v678_v60, %v679_v59  ;;  %v944_v60 = vld [vmem:[#allocation4 + $0x78] sm:$0xff] }
 0x147   : > { %v683_v7 = vsel %vm535_vm4, 0.0, %v681_v0  ;;  %945 = vmatpush.msrb.mxu0 %v944_v60  ;;  %v1000_v0 = vld [vmem:[#allocation4 + $0x170] sm:$0xff]  ;;  %v989_v60 = vld [vmem:[#allocation4 + $0x118] sm:$0xff] }
 0x149   : > { %v612_v61 = vpop.f32.mrf.mxu3 }
 0x14a   : > { %v673_v63 = vrot.slane %v612_v61, 7  ;;  %v1001_v61 = vld [vmem:[#allocation4 + $0x178] sm:$0xff] }
 0x14b   : > { %1002 = vmatpush.msrb.mxu1 %v1001_v61  ;;  %v972_v61 = vld [vmem:[#allocation4 + $0x98] sm:$0xff] }
 0x14c   : > { %v674_v2 = vsel %vm529_vm1, %v672_v62, %v673_v63  ;;  %v675_v3 = vsel %vm529_vm1, %v673_v63, %v672_v62  ;;  %v984_v62 = vld [vmem:[#allocation4 + $0xf8] sm:$0xff]  ;;  %v943_v63 = vld [vmem:[#allocation4 + $0x70] sm:$0xff] }
 0x14d   : > { %v676_v4 = vsel %vm525_vm2, 0.0, %v675_v3  ;;  %v705_v5 = vadd.f32 %v704_v1, %v674_v2  ;;  %v983_v1 = vld [vmem:[#allocation4 + $0xf0] sm:$0xff]  ;;  %v942_v2 = vld [vmem:[#allocation4 + $0x68] sm:$0xff]  ;;  %946 = vmatpush.msrb.mxu0 %v943_v63  ;;  %1003 = vmatpush.msrb.mxu1 %v1000_v0 }
 0x14e   : > { %v702_v8 = vadd.f32 %v701_v56, %v676_v4  ;;  %v999_v3 = vld [vmem:[#allocation4 + $0x168] sm:$0xff]  ;;  %v971_v63 = vld [vmem:[#allocation4 + $0x90] sm:$0xff] }
 0x14f   : > { %v708_v10 = vadd.f32 %v705_v5, %v683_v7  ;;  %v982_v4 = vld [vmem:[#allocation4 + $0xe8] sm:$0xff]  ;;  %v941_v5 = vld [vmem:[#allocation4 + $0x60] sm:$0xff]  ;;  %947 = vmatpush.msrb.mxu0 %v942_v2  ;;  %1004 = vmatpush.msrb.mxu1 %v999_v3 }
 0x150   : > { %v707_v11 = vadd.f32 %v702_v8, %v680_v9  ;;  %v981_v7 = vld [vmem:[#allocation4 + $0xe0] sm:$0xff]  ;;  %v940_v8 = vld [vmem:[#allocation4 + $0x58] sm:$0xff]  ;;  %v930_v0 = vld [vmem:[#allocation4 + $0x8] sm:$0xff] }
 0x151   : > { %v1944_v14 = vadd.f32 %v1437_v6, %v708_v10  ;;  %v997_v9 = vld [vmem:[#allocation4 + $0x158] sm:$0xff]  ;;  %948 = vmatpush.msrb.mxu0 %v941_v5  ;;  %v970_v2 = vld [vmem:[#allocation4 + $0x88] sm:$0xff]  ;;  %v986_v5 = vld [vmem:[#allocation4 + $0x100] sm:$0xff] }
 0x152   : > { %v1946_v15 = vadd.f32 %v1437_v6, %v707_v11  ;;  %v998_v6 = vld [vmem:[#allocation4 + $0x160] sm:$0xff]  ;;  %v980_v11 = vld [vmem:[#allocation4 + $0xd8] sm:$0xff] }
 0x153   : > { %v715_v16 = vmax.f32 %v1944_v14, 0.0  ;;  %1005 = vmatpush.msrb.mxu1 %v998_v6  ;;  %949 = vmatpush.msrb.mxu0 %v940_v8 }
 0x154   : > { %v714_v17 = vmax.f32 %v1946_v15, 0.0 }
 0x155   : > { %1006 = vmatpush.msrb.mxu1 %v997_v9 }
 0x156   : > { %v716_v18 = vadd.f32 %v715_v16, %v714_v17 }
 0x158   : > { %v717_v19 = vrot.slane %v716_v18, 4 }
 0x15a   : > { %v718_v20 = vadd.f32 %v717_v19, %v716_v18  ;;  %v939_v18 = vld [vmem:[#allocation4 + $0x50] sm:$0xff] }
 0x15b   : > { %v996_v19 = vld [vmem:[#allocation4 + $0x150] sm:$0xff]  ;;  %950 = vmatpush.msrb.mxu0 %v939_v18  ;;  %v1407_v18 = vld [vmem:[%s2204_s7 + $0x178] sm:$0xff] }
 0x15c   : > { %v719_v21 = vrot.slane %v718_v20, 2  ;;  %1007 = vmatpush.msrb.mxu1 %v996_v19  ;;  %v1391_v19 = vld [vmem:[%s2204_s7 + $0xf8] sm:$0xff] }
 0x15e   : > { %v720_v22 = vadd.f32 %v719_v21, %v718_v20  ;;  %v979_v20 = vld [vmem:[#allocation4 + $0xd0] sm:$0xff] }
 0x160   : > { %v721_v23 = vrot.slane %v720_v22, 1 }
 0x162   : > { %v722_v24 = vadd.f32 %v721_v23, %v720_v22  ;;  %v938_v22 = vld [vmem:[#allocation4 + $0x48] sm:$0xff] }
 0x163   : > { %v995_v23 = vld [vmem:[#allocation4 + $0x148] sm:$0xff]  ;;  %951 = vmatpush.msrb.mxu0 %v938_v22  ;;  %v1406_v22 = vld [vmem:[%s2204_s7 + $0x170] sm:$0xff] }
 0x164   : > { %755 = vmatmul.f32.vlgmr.msra.gmra.mxu2 %v722_v24  ;;  %v978_v24 = vld [vmem:[#allocation4 + $0xc8] sm:$0xff]  ;;  %1008 = vmatpush.msrb.mxu1 %v995_v23  ;;  %v1390_v23 = vld [vmem:[%s2204_s7 + $0xf0] sm:$0xff] }
 0x165   : > { %1037 = vmatpush.msra.mxu2 %v984_v62  ;;  %v988_v62 = vld [vmem:[#allocation4 + $0x110] sm:$0xff] }
 0x166   : > { %1009 = vmatpush.msrb.mxu1 %v994_v29  ;;  %v1389_v29 = vld [vmem:[%s2204_s7 + $0xe8] sm:$0xff] }
 0x167   : > { %1038 = vmatpush.msra.mxu2 %v983_v1  ;;  %v987_v1 = vld [vmem:[#allocation4 + $0x108] sm:$0xff] }
 0x169   : > { %1039 = vmatpush.msra.mxu2 %v982_v4  ;;  %v929_v4 = vld [vmem:[#allocation4] sm:$0xff] }
 0x16b   : > { %1040 = vmatpush.msra.mxu2 %v981_v7  ;;  %v969_v7 = vld [vmem:[#allocation4 + $0x80] sm:$0xff] }
 0x16d   : > { %1041 = vmatpush.msra.mxu2 %v980_v11  ;;  %v1117_v11 = vld [vmem:[%s2204_s7 + $0x78] sm:$0xff] }
 0x16f   : > { %1042 = vmatpush.msra.mxu2 %v979_v20 }
 0x171   : > { %1043 = vmatpush.msra.mxu2 %v978_v24  ;;  %v1115_v24 = vld [vmem:[%s2204_s7 + $0x68] sm:$0xff] }
 0x173   : > { %1044 = vmatpush.msra.mxu2 %v977_v31  ;;  %v1114_v31 = vld [vmem:[%s2204_s7 + $0x60] sm:$0xff] }
 0x1e7   : > { %v756_v25 = vpop.f32.mrf.mxu2 }
 0x1e8   : > { %v1954_v26 = vmul.f32 0.00390625, %v756_v25  ;;  %v937_v25 = vld [vmem:[#allocation4 + $0x40] sm:$0xff] }
 0x1e9   : > { %952 = vmatpush.msrb.mxu0 %v937_v25  ;;  %v1405_v25 = vld [vmem:[%s2204_s7 + $0x168] sm:$0xff] }
 0x1ea   : > { %1371 = vmatmul.msk.f32.vlgmr.msra.gmra.mxu3 %vm762_vm5, %v1954_v26  ;;  %vm844_vm14 = vcmp.ge.f32.partialorder %v1954_v26, 0.0 }
 0x1eb   : > { %v845_v57 = vsel %vm844_vm14, 1.0, %v1512_v38  ;;  %1118 = vmatpush.msra.mxu3 %v1117_v11  ;;  %v1107_v11 = vld [vmem:[%s2204_s7 + $0x28] sm:$0xff] }
 0x1ec   : > { %v846_v58 = vmul.f32 1e-08, %v845_v57  ;;  %v973_v57 = vld [vmem:[#allocation4 + $0xa0] sm:$0xff] }
 0x1ee   : > { %v1976_v59 = vadd.f32 %v846_v58, %v1954_v26 }
 0x1f0   : > { %vm853_vm6 = vweird.f32 %v1976_v59 }
 0x26d   : > { %v783_v34 = vpop.f32.mrf.mxu3 }
 0x26e   : > { %v784_v35 = vadd.f32 %v783_v34, %v761_v33  ;;  %v936_v33 = vld [vmem:[#allocation4 + $0x38] sm:$0xff] }
 0x26f   : > { %v993_v34 = vld [vmem:[#allocation4 + $0x138] sm:$0xff]  ;;  %953 = vmatpush.msrb.mxu0 %v936_v33 }
 0x270   : > { %vm794_vm7 = vcmp.ge.f32.partialorder %v784_v35, 0.0  ;;  %v793_v54 = vmul.f32 %v1372_v51, %v784_v35  ;;  %1010 = vmatpush.msrb.mxu1 %v993_v34  ;;  %v1388_v34 = vld [vmem:[%s2204_s7 + $0xe0] sm:$0xff] }
 0x271   : > { %v795_v39 = vsel %vm794_vm7, 1.0, %v1512_v38 }
 0x272   : > { %v796_v40 = vmul.f32 1e-08, %v795_v39  ;;  %v935_v39 = vld [vmem:[#allocation4 + $0x30] sm:$0xff] }
 0x273   : > { %954 = vmatpush.msrb.mxu0 %v935_v39  ;;  %v1113_v39 = vld [vmem:[%s2204_s7 + $0x58] sm:$0xff] }
 0x274   : > { %v797_v41 = vadd.f32 %v796_v40, %v784_v35  ;;  %v976_v35 = vld [vmem:[#allocation4 + $0xb8] sm:$0xff]  ;;  %v992_v40 = vld [vmem:[#allocation4 + $0x130] sm:$0xff] }
 0x275   : > { %1045 = vmatpush.msra.mxu2 %v976_v35  ;;  %1011 = vmatpush.msrb.mxu1 %v992_v40  ;;  %v1403_v40 = vld [vmem:[%s2204_s7 + $0x158] sm:$0xff] }
 0x276   : > { %1438 = vrcp.f32 %v797_v41  ;;  %v809_v47 = vand.u32 2147483648, %v797_v41  ;;  %v807_v49 = vand.u32 2147483647, %v797_v41  ;;  %vm803_vm10 = vweird.f32 %v797_v41 }
 0x277   : > { %1440 = vrcp.f32 %v1976_v59  ;;  %1012 = vmatpush.msrb.mxu1 %v991_v44 }
 0x278   : > { %v810_v53 = vor.u32 1.1754944e-38, %v809_v47  ;;  %vm808_vm12 = vcmp.eq.f32.partialorder %v807_v49, 8.507059e+37  ;;  %v859_v47 = vand.u32 2147483648, %v1976_v59 }
 0x27a   : > { %v860_v51 = vor.u32 1.1754944e-38, %v859_v47 }
 0x27c   : > { %v1439_v43 = vpop.eup %1438 }
 0x27d   : > { %v799_v45 = vmul.f32 %v1439_v43, %v797_v41  ;;  %vm804_vm9 = vweird.f32 %v1439_v43  ;;  %v1441_v10 = vpop.eup %1440  ;;  %v975_v41 = vld [vmem:[#allocation4 + $0xb0] sm:$0xff] }
 0x27e   : > { %vm805_vm11 = vmor %vm803_vm10, %vm804_vm9  ;;  %v849_v21 = vmul.f32 %v1441_v10, %v1976_v59  ;;  %1046 = vmatpush.msra.mxu2 %v975_v41  ;;  %vm854_vm15 = vweird.f32 %v1441_v10  ;;  %vm891_vm9 = vcmp.ge.f32.partialorder %v1946_v15, 0.0  ;;  %vm892_vm10 = vcmp.ge.f32.partialorder %v1944_v14, 0.0  ;;  %v1387_v41 = vld [vmem:[%s2204_s7 + $0xd8] sm:$0xff] }
 0x27f   : > { %v800_v46 = vsub.f32 1.0, %v799_v45  ;;  %v974_v45 = vld [vmem:[#allocation4 + $0xa8] sm:$0xff]  ;;  %vm855_vm7 = vmor %vm853_vm6, %vm854_vm15  ;;  %v894_v6 = vsel %vm892_vm10, 1.0, %v1512_v38 }
 0x280   : > { %v850_v32 = vsub.f32 1.0, %v849_v21  ;;  %1047 = vmatpush.msra.mxu2 %v974_v45  ;;  %v896_v8 = vmul.f32 1e-08, %v894_v6  ;;  %v1116_v21 = vld [vmem:[%s2204_s7 + $0x70] sm:$0xff]  ;;  %v1383_v6 = vld [vmem:[%s2204_s7 + $0xb8] sm:$0xff] }
 0x281   : > { %v801_v48 = vmul.f32 %v1439_v43, %v800_v46  ;;  %1119 = vmatpush.msra.mxu3 %v1116_v21  ;;  %v1396_v21 = vld [vmem:[%s2204_s7 + $0x120] sm:$0xff] }
 0x282   : > { %v851_v42 = vmul.f32 %v1441_v10, %v850_v32  ;;  %1048 = vmatpush.msra.mxu2 %v973_v57  ;;  %v1994_v9 = vadd.f32 %v896_v8, %v1944_v14  ;;  %v1404_v32 = vld [vmem:[%s2204_s7 + $0x160] sm:$0xff]  ;;  %v1386_v14 = vld [vmem:[%s2204_s7 + $0xd0] sm:$0xff] }
 0x283   : > { %v802_v52 = vadd.f32 %v1439_v43, %v801_v48  ;;  %v857_v48 = vand.u32 2147483647, %v1976_v59  ;;  %v932_v59 = vld [vmem:[#allocation4 + $0x18] sm:$0xff]  ;;  %1120 = vmatpush.msra.mxu3 %v1115_v24  ;;  %v1398_v8 = vld [vmem:[%s2204_s7 + $0x130] sm:$0xff] }
 0x284   : > { %v852_v46 = vadd.f32 %v1441_v10, %v851_v42  ;;  %1049 = vmatpush.msra.mxu2 %v972_v61  ;;  %v925_v57 = vand.u32 2147483648, %v1994_v9  ;;  %vm919_vm15 = vweird.f32 %v1994_v9  ;;  %v1105_v24 = vld [vmem:[%s2204_s7 + $0x18] sm:$0xff] }
 0x285   : > { %v806_v55 = vsel %vm805_vm11, %v1439_v43, %v802_v52  ;;  %v934_v43 = vld [vmem:[#allocation4 + $0x28] sm:$0xff]  ;;  %vm858_vm8 = vcmp.eq.f32.partialorder %v857_v48, 8.507059e+37  ;;  %1121 = vmatpush.msra.mxu3 %v1114_v31  ;;  %v1104_v31 = vld [vmem:[%s2204_s7 + $0x10] sm:$0xff] }
 0x286   : > { %v811_v56 = vsel %vm808_vm12, %v810_v53, %v806_v55  ;;  %955 = vmatpush.msrb.mxu0 %v934_v43  ;;  %v856_v49 = vsel %vm855_vm7, %v1441_v10, %v852_v46  ;;  %v893_v55 = vsel %vm891_vm9, 1.0, %v1512_v38  ;;  %1050 = vmatpush.msra.mxu2 %v971_v63  ;;  %v1401_v63 = vld [vmem:[%s2204_s7 + $0x148] sm:$0xff]  ;;  %vm1065_vm9 = vcmp.ge.f32.partialorder %v1870_v36, 0.0 }
 0x287   : > { %v812_v12 = vmul.f32 %v811_v56, %v793_v54  ;;  %v861_v53 = vsel %vm858_vm8, %v860_v51, %v856_v49  ;;  %v933_v56 = vld [vmem:[#allocation4 + $0x20] sm:$0xff]  ;;  %v895_v58 = vmul.f32 1e-08, %v893_v55  ;;  %1122 = vmatpush.msra.mxu3 %v1113_v39  ;;  %vm1064_vm8 = vcmp.ge.f32.partialorder %v1855_v28, 0.0  ;;  %v1393_v39 = vld [vmem:[%s2204_s7 + $0x108] sm:$0xff] }
 0x288   : > { %956 = vmatpush.msrb.mxu0 %v933_v56  ;;  %1051 = vmatpush.msra.mxu2 %v970_v2  ;;  %v1400_v2 = vld [vmem:[%s2204_s7 + $0x140] sm:$0xff] }
 0x289   : > { %1374 = vmatmul.msk.f32.vlgmr.msrb.gmra.mxu2 %vm815_vm13, %v812_v12  ;;  %v990_v12 = vld [vmem:[#allocation4 + $0x120] sm:$0xff]  ;;  %v1989_v3 = vadd.f32 %v895_v58, %v1946_v15  ;;  %v923_v58 = vand.u32 2147483647, %v1994_v9 }
 0x28a   : > { %1013 = vmatpush.msrb.mxu1 %v990_v12  ;;  %957 = vmatpush.msrb.mxu0 %v932_v59 }
 0x28b   : > { %1442 = vrcp.f32 %v1989_v3  ;;  %1052 = vmatpush.msra.mxu2 %v969_v7  ;;  %v910_v47 = vand.u32 2147483648, %v1989_v3  ;;  %vm904_vm11 = vweird.f32 %v1989_v3  ;;  %v908_v49 = vand.u32 2147483647, %v1989_v3  ;;  %v1108_v7 = vld [vmem:[%s2204_s7 + $0x30] sm:$0xff] }
 0x28c   : > { %1014 = vmatpush.msrb.mxu1 %v989_v60  ;;  %1444 = vrcp.f32 %v1994_v9  ;;  %vm924_vm7 = vcmp.eq.f32.partialorder %v923_v58, 8.507059e+37 }
 0x28d   : > { %vm909_vm13 = vcmp.eq.f32.partialorder %v908_v49, 8.507059e+37 }
 0x28e   : > { %1015 = vmatpush.msrb.mxu1 %v988_v62  ;;  %v1402_v62 = vld [vmem:[%s2204_s7 + $0x150] sm:$0xff] }
 0x290   : > { %1016 = vmatpush.msrb.mxu1 %v987_v1  ;;  %v1110_v1 = vld [vmem:[%s2204_s7 + $0x40] sm:$0xff] }
 0x291   : > { %v1443_v10 = vpop.eup %1442 }
 0x292   : > { %1017 = vmatpush.msrb.mxu1 %v986_v5  ;;  %v900_v20 = vmul.f32 %v1443_v10, %v1989_v3  ;;  %v1445_v35 = vpop.eup %1444  ;;  %v1384_v3 = vld [vmem:[%s2204_s7 + $0xc0] sm:$0xff]  ;;  %v1399_v5 = vld [vmem:[%s2204_s7 + $0x138] sm:$0xff] }
 0x293   : > { %v915_v43 = vmul.f32 %v1445_v35, %v1994_v9  ;;  %vm920_vm14 = vweird.f32 %v1445_v35  ;;  %v1382_v9 = vld [vmem:[%s2204_s7 + $0xb0] sm:$0xff] }
 0x294   : > { %1210 = vmatpush.msra.mxu1 %v1391_v19  ;;  %v901_v33 = vsub.f32 1.0, %v900_v20  ;;  %vm921_vm6 = vmor %vm919_vm15, %vm920_vm14  ;;  %v1381_v19 = vld [vmem:[%s2204_s7 + $0xa8] sm:$0xff]  ;;  %v1106_v20 = vld [vmem:[%s2204_s7 + $0x20] sm:$0xff] }
 0x295   : > { %v916_v45 = vsub.f32 1.0, %v915_v43  ;;  %v1376_v43 = vld [vmem:[%s2204_s7 + $0x80] sm:$0xff] }
 0x296   : > { %1211 = vmatpush.msra.mxu1 %v1390_v23  ;;  %v902_v42 = vmul.f32 %v1443_v10, %v901_v33  ;;  %v1378_v33 = vld [vmem:[%s2204_s7 + $0x90] sm:$0xff] }
 0x298   : > { %1212 = vmatpush.msra.mxu1 %v1389_v29  ;;  %v903_v44 = vadd.f32 %v1443_v10, %v902_v42  ;;  %v1379_v29 = vld [vmem:[%s2204_s7 + $0x98] sm:$0xff]  ;;  %v1392_v42 = vld [vmem:[%s2204_s7 + $0x100] sm:$0xff] }
 0x29a   : > { %1213 = vmatpush.msra.mxu1 %v1388_v34 }
 0x29c   : > { %1214 = vmatpush.msra.mxu1 %v1387_v41  ;;  %v1067_v41 = vsel %vm1065_vm9, 1.0, %v1512_v38 }
 0x29e   : > { %1215 = vmatpush.msra.mxu1 %v1386_v14 }
 0x30c   : > { %v840_v50 = vpop.f32.mrf.mxu2 }
 0x30d   : > { %v843_v52 = vmul.f32 %v840_v50, %v1954_v26  ;;  %v931_v26 = vld [vmem:[#allocation4 + $0x10] sm:$0xff] }
 0x30e   : > { %958 = vmatpush.msrb.mxu0 %v931_v26  ;;  %v1112_v26 = vld [vmem:[%s2204_s7 + $0x50] sm:$0xff] }
 0x30f   : > { %v862_v54 = vmul.f32 %v861_v53, %v843_v52  ;;  %v917_v52 = vmul.f32 %v1445_v35, %v916_v45  ;;  %v911_v53 = vor.u32 1.1754944e-38, %v910_v47  ;;  %1123 = vmatpush.msra.mxu3 %v1112_v26 }
 0x310   : > { %959 = vmatpush.msrb.mxu0 %v930_v0  ;;  %v1385_v0 = vld [vmem:[%s2204_s7 + $0xc8] sm:$0xff] }
 0x311   : > { %1375 = vmatmul.msk.f32.vlgmr.msrb.gmra.mxu3 %vm762_vm5, %v862_v54  ;;  %vm905_vm5 = vweird.f32 %v1443_v10  ;;  %v918_v12 = vadd.f32 %v1445_v35, %v917_v52  ;;  %1216 = vmatpush.msra.mxu1 %v1385_v0 }
 0x312   : > { %960 = vmatpush.msrb.mxu0 %v929_v4  ;;  %vm906_vm12 = vmor %vm904_vm11, %vm905_vm5  ;;  %v1109_v4 = vld [vmem:[%s2204_s7 + $0x38] sm:$0xff] }
 0x313   : > { %v907_v51 = vsel %vm906_vm12, %v1443_v10, %v903_v44  ;;  %v922_v15 = vsel %vm921_vm6, %v1445_v35, %v918_v12  ;;  %1217 = vmatpush.msra.mxu1 %v1384_v3  ;;  %v1066_v10 = vsel %vm1064_vm8, 1.0, %v1512_v38  ;;  %v1103_v35 = vld [vmem:[%s2204_s7 + $0x8] sm:$0xff]  ;;  %v1069_v44 = vmul.f32 1e-08, %v1067_v41 }
 0x314   : > { %1175 = vmatpush.msra.mxu0 %v1407_v18  ;;  %v912_v55 = vsel %vm909_vm13, %v911_v53, %v907_v51  ;;  %v1397_v18 = vld [vmem:[%s2204_s7 + $0x128] sm:$0xff]  ;;  %v1068_v23 = vmul.f32 1e-08, %v1066_v10 }
 0x315   : > { %1218 = vmatpush.msra.mxu1 %v1383_v6  ;;  %v1071_v38 = vadd.f32 %v1069_v44, %v1870_v36 }
 0x316   : > { %1176 = vmatpush.msra.mxu0 %v1406_v22  ;;  %v1380_v22 = vld [vmem:[%s2204_s7 + $0xa0] sm:$0xff]  ;;  %v1070_v34 = vadd.f32 %v1068_v23, %v1855_v28 }
 0x317   : > { %1219 = vmatpush.msra.mxu1 %v1382_v9  ;;  %v1102_v28 = vld [vmem:[%s2204_s7] sm:$0xff]  ;;  %vm1092_vm14 = vweird.f32 %v1071_v38 }
 0x318   : > { %1177 = vmatpush.msra.mxu0 %v1405_v25  ;;  %v1395_v25 = vld [vmem:[%s2204_s7 + $0x118] sm:$0xff]  ;;  %1446 = vrcp.f32 %v1070_v34  ;;  %vm1077_vm5 = vweird.f32 %v1070_v34  ;;  %v1081_v26 = vand.u32 2147483647, %v1070_v34 }
 0x319   : > { %1220 = vmatpush.msra.mxu1 %v1381_v19  ;;  %1448 = vrcp.f32 %v1071_v38 }
 0x31a   : > { %1178 = vmatpush.msra.mxu0 %v1404_v32  ;;  %v1394_v32 = vld [vmem:[%s2204_s7 + $0x110] sm:$0xff]  ;;  %vm1082_vm12 = vcmp.eq.f32.partialorder %v1081_v26, 8.507059e+37 }
 0x31b   : > { %1221 = vmatpush.msra.mxu1 %v1380_v22 }
 0x31c   : > { %1179 = vmatpush.msra.mxu0 %v1403_v40  ;;  %v1377_v40 = vld [vmem:[%s2204_s7 + $0x88] sm:$0xff] }
 0x31d   : > { %1222 = vmatpush.msra.mxu1 %v1379_v29 }
 0x31e   : > { %1180 = vmatpush.msra.mxu0 %v1402_v62  ;;  %v1447_v45 = vpop.eup %1446 }
 0x31f   : > { %1223 = vmatpush.msra.mxu1 %v1378_v33  ;;  %vm1078_vm10 = vweird.f32 %v1447_v45 }
 0x320   : > { %1181 = vmatpush.msra.mxu0 %v1401_v63  ;;  %vm1079_vm11 = vmor %vm1077_vm5, %vm1078_vm10 }
 0x321   : > { %1224 = vmatpush.msra.mxu1 %v1377_v40 }
 0x322   : > { %1182 = vmatpush.msra.mxu0 %v1400_v2 }
 0x323   : > { %1225 = vmatpush.msra.mxu1 %v1376_v43 }
 0x324   : > { %1183 = vmatpush.msra.mxu0 %v1399_v5 }
 0x326   : > { %1184 = vmatpush.msra.mxu0 %v1398_v8 }
 0x328   : > { %1185 = vmatpush.msra.mxu0 %v1397_v18  ;;  %v1096_v18 = vand.u32 2147483647, %v1071_v38 }
 0x32a   : > { %1186 = vmatpush.msra.mxu0 %v1396_v21  ;;  %vm1097_vm6 = vcmp.eq.f32.partialorder %v1096_v18, 8.507059e+37 }
 0x32c   : > { %1187 = vmatpush.msra.mxu0 %v1395_v25 }
 0x32e   : > { %1188 = vmatpush.msra.mxu0 %v1394_v32 }
 0x330   : > { %1189 = vmatpush.msra.mxu0 %v1393_v39 }
 0x332   : > { %1190 = vmatpush.msra.mxu0 %v1392_v42 }
 0x394   : > { %v884_v46 = vpop.f32.mrf.mxu3 }
 0x395   : > { %v887_v48 = vmul.f32 0.00390625, %v884_v46  ;;  %v1073_v46 = vmul.f32 %v1447_v45, %v1070_v34 }
 0x397   : > { %v888_v50 = vperm.slane %v887_v48, 0  ;;  %v1074_v49 = vsub.f32 1.0, %v1073_v46 }
 0x399   : > { %v889_v54 = vmul.f32 %v888_v50, %v714_v17  ;;  %v890_v59 = vmul.f32 %v888_v50, %v715_v16  ;;  %v926_v17 = vor.u32 1.1754944e-38, %v925_v57  ;;  %v1111_v16 = vld [vmem:[%s2204_s7 + $0x48] sm:$0xff]  ;;  %v1449_v50 = vpop.eup %1448  ;;  %v1075_v51 = vmul.f32 %v1447_v45, %v1074_v49  ;;  %v1451_v49 = vld [vmem:[%s1659_s26] sm:$0xff] }
 0x39a   : > { %1124 = vmatpush.msra.mxu3 %v1111_v16  ;;  %v1088_v53 = vmul.f32 %v1449_v50, %v1071_v38  ;;  %vm1093_vm13 = vweird.f32 %v1449_v50 }
 0x39b   : > { %v913_v56 = vmul.f32 %v912_v55, %v889_v54  ;;  %v927_v60 = vsel %vm924_vm7, %v926_v17, %v922_v15  ;;  %v1076_v58 = vadd.f32 %v1447_v45, %v1075_v51  ;;  %vm1094_vm15 = vmor %vm1092_vm14, %vm1093_vm13 }
 0x39c   : > { %v928_v61 = vmul.f32 %v927_v60, %v890_v59  ;;  %1125 = vmatpush.msra.mxu3 %v1110_v1  ;;  %v1089_v59 = vsub.f32 1.0, %v1088_v53  ;;  %v1083_v60 = vand.u32 2147483648, %v1070_v34 }
 0x39d   : > { %961 = vmatmul.f32.vlgmr.msrb.gmra.mxu0 %v913_v56  ;;  %1018 = vmatmul.f32.vlgmr.msrb.gmra.mxu1 %v913_v56  ;;  %v1080_v14 = vsel %vm1079_vm11, %v1447_v45, %v1076_v58 }
 0x39e   : > { %1053 = vmatmul.f32.vlgmr.msra.gmra.mxu2 %v913_v56  ;;  %1126 = vmatpush.msra.mxu3 %v1109_v4  ;;  %v1090_v2 = vmul.f32 %v1449_v50, %v1089_v59  ;;  %v1084_v4 = vor.u32 1.1754944e-38, %v1083_v60 }
 0x3a0   : > { %1127 = vmatpush.msra.mxu3 %v1108_v7  ;;  %v1085_v7 = vsel %vm1082_vm12, %v1084_v4, %v1080_v14  ;;  %v1091_v10 = vadd.f32 %v1449_v50, %v1090_v2 }
 0x3a2   : > { %1128 = vmatpush.msra.mxu3 %v1107_v11  ;;  %v1098_v11 = vand.u32 2147483648, %v1071_v38 }
 0x3a4   : > { %1129 = vmatpush.msra.mxu3 %v1106_v20  ;;  %v1095_v20 = vsel %vm1094_vm15, %v1449_v50, %v1091_v10 }
 0x3a5   : > { %964 = vmatmul.f32.gmra.mxu0 %v928_v61  ;;  %1021 = vmatmul.f32.gmra.mxu1 %v928_v61 }
 0x3a6   : > { %1056 = vmatmul.f32.gmra.mxu2 %v928_v61  ;;  %1130 = vmatpush.msra.mxu3 %v1105_v24 }
 0x3a8   : > { %1131 = vmatpush.msra.mxu3 %v1104_v31 }
 0x3aa   : > { %1132 = vmatpush.msra.mxu3 %v1103_v35 }
 0x3ac   : > { %1133 = vmatpush.msra.mxu3 %v1102_v28 }
 0x41a   : > { %v962_v47 = vpop.f32.mrf.mxu0  ;;  %v1019_v48 = vpop.f32.mrf.mxu1 }
 0x41b   : > { %v1025_v56 = vrot.slane %v962_v47, 7  ;;  %v1031_v15 = vrot.slane %v1019_v48, 1  ;;  %v1450_v47 = vld [vmem:[%s1659_s26 + $0x8] sm:$0xff] }
 0x421   : > { %v1054_v52 = vpop.f32.mrf.mxu2 }
 0x422   : > { %v965_v54 = vpop.f32.mrf.mxu0  ;;  %v1022_v55 = vpop.f32.mrf.mxu1 }
 0x423   : > { %v1026_v12 = vrot.slane %v965_v54, 7  ;;  %v1032_v57 = vrot.slane %v1022_v55, 1 }
 0x425   : > { %v1028_v36 = vsel %vm529_vm1, %v1026_v12, %v1025_v56  ;;  %v1033_v62 = vsel %vm538_vm3, %v1031_v15, %v1032_v57  ;;  %v1027_v63 = vsel %vm529_vm1, %v1025_v56, %v1026_v12  ;;  %v1034_v0 = vsel %vm538_vm3, %v1032_v57, %v1031_v15 }
 0x426   : > { %v1029_v17 = vsel %vm525_vm2, 0.0, %v1028_v36  ;;  %v1036_v6 = vsel %vm535_vm4, 0.0, %v1034_v0 }
 0x427   : > { %v1055_v61 = vadd.f32 %v1054_v52, %v1029_v17 }
 0x429   : > { %v1060_v16 = vadd.f32 %v1055_v61, %v1033_v62  ;;  %v1057_v1 = vpop.f32.mrf.mxu2 }
 0x42a   : > { %v1058_v3 = vadd.f32 %v1057_v1, %v1027_v63 }
 0x42b   : > { %v1062_v5 = vmul.f32 %v1060_v16, %v1861_v30  ;;  %v1099_v30 = vor.u32 1.1754944e-38, %v1098_v11 }
 0x42c   : > { %v1061_v8 = vadd.f32 %v1058_v3, %v1036_v6 }
 0x42d   : > { %v1086_v9 = vmul.f32 %v1085_v7, %v1062_v5  ;;  %v1100_v21 = vsel %vm1097_vm6, %v1099_v30, %v1095_v20 }
 0x42e   : > { %v1063_v19 = vmul.f32 %v1061_v8, %v1873_v37 }
 0x42f   : > { %1134 = vmatmul.f32.vlgmr.msra.gmra.mxu3 %v1086_v9  ;;  %1191 = vmatmul.f32.vlgmr.msra.gmra.mxu0 %v1086_v9 }
 0x430   : > { %1226 = vmatmul.f32.vlgmr.msra.gmra.mxu1 %v1086_v9  ;;  %v1101_v22 = vmul.f32 %v1100_v21, %v1063_v19 }
 0x437   : > { %1137 = vmatmul.f32.gmra.mxu3 %v1101_v22  ;;  %1194 = vmatmul.f32.gmra.mxu0 %v1101_v22 }
 0x438   : > { %1229 = vmatmul.f32.gmra.mxu1 %v1101_v22 }
 0x4ac   : > { %v1192_v23 = vpop.f32.mrf.mxu0 }
 0x4ad   : > { %v1227_v25 = vpop.f32.mrf.mxu1  ;;  %v1204_v32 = vrot.slane %v1192_v23, 1 }
 0x4b2   : > { %v1135_v24 = vpop.f32.mrf.mxu3 }
 0x4b3   : > { %v1198_v34 = vrot.slane %v1135_v24, 7 }
 0x4b4   : > { %v1195_v29 = vpop.f32.mrf.mxu0 }
 0x4b5   : > { %v1205_v31 = vrot.slane %v1195_v29, 1  ;;  %v1230_v39 = vpop.f32.mrf.mxu1 }
 0x4b7   : > { %v1207_v35 = vsel %vm538_vm3, %v1205_v31, %v1204_v32  ;;  %v1206_v38 = vsel %vm538_vm3, %v1204_v32, %v1205_v31 }
 0x4b8   : > { %v1209_v43 = vsel %vm535_vm4, 0.0, %v1207_v35 }
 0x4ba   : > { %v1138_v33 = vpop.f32.mrf.mxu3 }
 0x4bb   : > { %v1199_v37 = vrot.slane %v1138_v33, 7 }
 0x4bd   : > { %v1200_v40 = vsel %vm529_vm1, %v1198_v34, %v1199_v37  ;;  %v1201_v41 = vsel %vm529_vm1, %v1199_v37, %v1198_v34 }
 0x4be   : > { %v1202_v28 = vsel %vm525_vm2, 0.0, %v1201_v41  ;;  %v1231_v42 = vadd.f32 %v1230_v39, %v1200_v40 }
 0x4bf   : > { %v1228_v44 = vadd.f32 %v1227_v25, %v1202_v28 }
 0x4c0   : > { %v1234_v45 = vadd.f32 %v1231_v42, %v1209_v43 }
 0x4c1   : > { %v1233_v46 = vadd.f32 %v1228_v44, %v1206_v38 }
 0x4c2   : > { %v1236_v48 = vmul.f32 %v1450_v47, %v1234_v45 }
 0x4c3   : > { %v1235_v50 = vmul.f32 %v1451_v49, %v1233_v46 }
 0x4c4   : > { %1238 = vst.msk [vmem:[%s439_s15 + $0x8] sm:$0xff] %vm451_vm0, %v1236_v48 }
 0x4c5   : > { %1237 = vst.msk [vmem:[%s439_s15] sm:$0xff] %vm451_vm0, %v1235_v50 }
 0x4c6 PF: > { %s32_s29 = sadd.s32 1, %s1506_s29  }
 0x4c7   : > { %p29_p7 = scmp.ge.s32.totalorder %s32_s29, 4  }
 0x4c9   :  { %31 = sbr.rel (!%p29_p7) target bundleno = 7 (0x7), region = 111 }
 0x4ce   :  { %1260 = vsyncpa [#allocation5], 1 }
 0x4cf   :  { %1262 = vsyncpa [#allocation5 + $0x1], 1 }

</bundles_post_ra>
